<compile_context>
chip_gen: v6e
topology: v6e:2x2x1
jax: 0.10.0
libtpu: 0.0.40
codegen_flags: <defaults>
</compile_context>

<pallas_src>
import math

import jax
import jax.numpy as jnp
import numpy as np
from jax.experimental import pallas as pl
from jax.experimental.pallas import tpu as pltpu


def _make_kernel(Bt, L, P, NH, HD, *, eps=1e-5, use_bf16_matmul=False):
    H = NH * HD
    H2 = 2 * H
    C = NH * L                       # lane-packed score width (one L-chunk per head)
    pscale = P ** (-0.5)
    lp = jnp.bfloat16 if use_bf16_matmul else jnp.float32   # low-precision MXU operand dtype

    def kernel(x_ref, vec_ref, bias_ref,
               wq_ref, wkv_ref, wo_ref,
               mask_k_ref, mask_v_ref,
               gamma_ref, beta_ref,
               out_ref):
        # ---------------- projections (MXU) ----------------
        x2 = x_ref[...].reshape(Bt * L, H)                    # [Bt*L, H]
        vec2 = vec_ref[...].reshape(Bt * L * P, H)            # [Bt*L*P, H] native (l, p) order

        q = jnp.dot(x2, wq_ref[...], preferred_element_type=jnp.float32)        # [Bt*L, H]
        # one fused N=4H=256 matmul for all four vec projections
        ab = jnp.dot(vec2.astype(lp), wkv_ref[...].astype(lp),
                     preferred_element_type=jnp.float32)                        # [Bt*L*P, 4H]
        prod = ab[:, :H2] * ab[:, H2:]                        # [k1*k2 | v1*v2], vreg-aligned split

        # reduce over the interleaved position-feature axis p (P sublane rows per (b, l))
        kv = prod.reshape(Bt, L, P, H2).sum(axis=2) * pscale  # [Bt, L, 2H] == [k | v]
        k = kv[:, :, :H]                                      # [Bt, L, H]
        v = kv[:, :, H:]                                      # [Bt, L, H]
        q3 = q.reshape(Bt, L, H)

        # ---------------- lane-packed (block-diagonal) attention core ----------------
        # k_bd[b, d, h*L+j] = k[b, j, d] if d//HD == h else 0   -> scores are [Bt, L, NH*L]
        # v_bd[b, h*L+j, d] = v[b, j, d] if d//HD == h else 0   -> output lands as [Bt, L, H]
        kT = jnp.transpose(k, (0, 2, 1))                                   # [Bt, H, L]
        k_bd = jnp.concatenate([kT] * NH, axis=-1) * mask_k_ref[...]       # [Bt, H, C]
        v_bd = jnp.concatenate([v] * NH, axis=1) * mask_v_ref[...]         # [Bt, C, H]

        # scores (MemEff explicit path: no q scaling, key_padding_mask ignored with attn_bias)
        s = jnp.einsum('bqd,bdc->bqc', q3, k_bd,
                       preferred_element_type=jnp.float32)                 # [Bt, L, C]

        # bias relayout once, in-kernel: [Bt, NH, L, L] -> [Bt, L, NH*L]
        b4 = bias_ref[...]
        bias = jnp.concatenate([b4[:, h] for h in range(NH)], axis=-1)     # [Bt, L, C]
        s = s + bias

        # per-head max (stats only); the exp itself stays on the lane-dense layout
        m = jnp.concatenate(
            [jnp.broadcast_to(
                jnp.max(s[:, :, h * L:(h + 1) * L], axis=-1, keepdims=True), (Bt, L, L))
             for h in range(NH)], axis=-1)                                 # [Bt, L, C]
        e = jnp.exp(s - m)                                                 # [Bt, L, C]

        # un-normalized PV matmul; normalize afterwards — the per-head softmax denominator is
        # produced by a 0/1-mask matmul, already broadcast across each head's HD channels.
        o_un = jnp.einsum('bqc,bcd->bqd', e.astype(lp), v_bd.astype(lp),
                          preferred_element_type=jnp.float32)              # [Bt, L, H]
        denom = jnp.dot(e.reshape(Bt * L, C), mask_v_ref[...],
                        preferred_element_type=jnp.float32).reshape(Bt, L, H)
        attn = o_un * pl.reciprocal(denom, approx=False)                   # [Bt, L, H]

        # ---------------- LayerNorm over hidden dim + out_proj (f32) ----------------
        a2 = attn.reshape(Bt * L, H)
        mean = jnp.mean(a2, axis=-1, keepdims=True)
        cent = a2 - mean
        var = jnp.mean(cent * cent, axis=-1, keepdims=True)
        normed = cent * jax.lax.rsqrt(var + eps)
        normed = normed * gamma_ref[...] + beta_ref[...]
        out = jnp.dot(normed, wo_ref[...], preferred_element_type=jnp.float32)   # [Bt*L, H]
        out_ref[...] = out.reshape(Bt, L, H).astype(out_ref.dtype)

    return kernel


def invariant2equivariant_attention(x, vec, attn_bias, params, num_heads, head_dim,
                                     block_b=None, use_bf16_matmul=False):
    """x: [B, L, H], vec: [B, L, P, H], attn_bias: [B, NH, L, L]. Returns [B, L, H]."""
    B, L, H = x.shape
    P = vec.shape[2]
    NH, HD = num_heads, head_dim
    C = NH * L
    assert NH * HD == H
    assert attn_bias.shape == (B, NH, L, L)

    # --- Bt selection: largest divisor of B with >= 2 grid steps (pipelining + v7x 2-TC
    #     sharding) and at most ~256 query rows per step. ---
    if block_b is None:
        row_cap = max(1, 256 // max(L, 1))
        block_b = 1
        for d in range(1, B + 1):
            if B % d == 0 and d <= row_cap and (B // d) >= 2:
                block_b = d
    Bt = block_b
    assert B % Bt == 0

    # No HBM relayouts of the big inputs: vec consumed in native (l, p) order (free reshape),
    # attn_bias consumed in its native [B, NH, L, L] layout.
    vec_flat = vec.reshape(B, L * P, H)

    # Fused projection weight: one [H, 4H] matmul yields k1|v1|k2|v2 for every vec row.
    wq_t = params["wq"].T                                                 # [H, H]
    wkv = jnp.concatenate([params["wk1"].T, params["wv1"].T,
                           params["wk2"].T, params["wv2"].T], axis=1)     # [H, 4H]
    wo_t = params["wo"].T                                                 # [H, H]
    gamma = params["ln_gamma"].reshape(1, H)
    beta = params["ln_beta"].reshape(1, H)

    # Block-diagonal 0/1 masks for the lane-packed attention core (precomputed, tiny).
    head_of_ch = np.arange(H) // HD                                       # [H]
    head_of_col = np.arange(C) // L                                       # [C]
    mask_k = jnp.asarray((head_of_ch[:, None] == head_of_col[None, :]).astype(np.float32))  # [H, C]
    mask_v = jnp.asarray((head_of_col[:, None] == head_of_ch[None, :]).astype(np.float32))  # [C, H]

    kernel = _make_kernel(Bt, L, P, NH, HD, use_bf16_matmul=use_bf16_matmul)

    out = pl.pallas_call(
        kernel,
        out_shape=jax.ShapeDtypeStruct((B, L, H), x.dtype),
        grid_spec=pltpu.PrefetchScalarGridSpec(
            num_scalar_prefetch=0,
            grid=(B // Bt,),
            in_specs=[
                pl.BlockSpec((Bt, L, H), lambda b: (b, 0, 0)),            # x
                pl.BlockSpec((Bt, L * P, H), lambda b: (b, 0, 0)),        # vec (native order)
                pl.BlockSpec((Bt, NH, L, L), lambda b: (b, 0, 0, 0)),     # attn_bias (native)
                pl.BlockSpec((H, H), lambda b: (0, 0)),                   # Wq^T
                pl.BlockSpec((H, 4 * H), lambda b: (0, 0)),               # [Wk1|Wv1|Wk2|Wv2]^T
                pl.BlockSpec((H, H), lambda b: (0, 0)),                   # Wo^T
                pl.BlockSpec((H, C), lambda b: (0, 0)),                   # block-diag mask (K side)
                pl.BlockSpec((C, H), lambda b: (0, 0)),                   # block-diag mask (V side)
                pl.BlockSpec((1, H), lambda b: (0, 0)),                   # LN gamma
                pl.BlockSpec((1, H), lambda b: (0, 0)),                   # LN beta
            ],
            out_specs=pl.BlockSpec((Bt, L, H), lambda b: (b, 0, 0)),
        ),
        compiler_params=pltpu.CompilerParams(
            dimension_semantics=("parallel",),          # batch blocks independent (2 TCs on v7x)
            vmem_limit_bytes=64 * 1024 * 1024),
    )(x, vec_flat, attn_bias, wq_t, wkv, wo_t, mask_k, mask_v, gamma, beta)

    return out


def reference_jax(x, vec, attn_bias, params, num_heads, head_dim):
    """Pure-JAX reference reproducing the PyTorch forward (eval mode, dropout=0)."""
    B, L, H = x.shape
    P = vec.shape[2]
    NH, HD = num_heads, head_dim
    q = x @ params["wq"].T
    k1 = vec @ params["wk1"].T
    k2 = vec @ params["wk2"].T
    k = (k1 * k2).sum(axis=-2) * P ** (-0.5)
    v1 = vec @ params["wv1"].T
    v2 = vec @ params["wv2"].T
    v = (v1 * v2).sum(axis=-2) * P ** (-0.5)

    qh = q.reshape(B, L, NH, HD).transpose(0, 2, 1, 3)
    kh = k.reshape(B, L, NH, HD).transpose(0, 2, 1, 3)
    vh = v.reshape(B, L, NH, HD).transpose(0, 2, 1, 3)

    s = jnp.einsum("bhqd,bhkd->bhqk", qh, kh) + attn_bias
    probs = jax.nn.softmax(s.astype(jnp.float32), axis=-1)
    o = jnp.einsum("bhqk,bhkd->bhqd", probs.astype(vh.dtype), vh)
    o = o.transpose(0, 2, 1, 3).reshape(B, L, H)

    mean = o.mean(axis=-1, keepdims=True)
    var = ((o - mean) ** 2).mean(axis=-1, keepdims=True)
    o = (o - mean) / jnp.sqrt(var + 1e-5)
    o = o * params["ln_gamma"] + params["ln_beta"]
    return o @ params["wo"].T


def _xavier_uniform(key, out_f, in_f, gain=1.0):
    a = gain * math.sqrt(6.0 / (in_f + out_f))
    return jax.random.uniform(key, (out_f, in_f), jnp.float32, minval=-a, maxval=a)


if __name__ == "__main__":
    # Small shapes consistent with the module.
    B, L, P = 2, 16, 8
    H, HD = 64, 16
    NH = H // HD

    root = jax.random.PRNGKey(0)
    keys = jax.random.split(root, 10)

    params = {
        "wq": _xavier_uniform(keys[0], H, H),
        "wk1": _xavier_uniform(keys[1], H, H),
        "wk2": _xavier_uniform(keys[2], H, H),
        "wv1": _xavier_uniform(keys[3], H, H),
        "wv2": _xavier_uniform(keys[4], H, H),
        "wo": _xavier_uniform(keys[5], H, H),
        "ln_gamma": jnp.ones((H,), jnp.float32),   # nn.LayerNorm default init
        "ln_beta": jnp.zeros((H,), jnp.float32),
    }

    x = jax.random.normal(keys[6], (B, L, H), jnp.float32)
    vec = jax.random.normal(keys[7], (B, L, P, H), jnp.float32)
    attn_bias = 0.1 * jax.random.normal(keys[8], (B, NH, L, L), jnp.float32)

    out = invariant2equivariant_attention(x, vec, attn_bias, params, NH, HD)
    out = jax.block_until_ready(out)

    # Full-precision f32 reference (avoid any bf16 default-precision in the XLA reference).
    with jax.default_matmul_precision("highest"):
        ref = reference_jax(x, vec, attn_bias, params, NH, HD)
    ref = jax.block_until_ready(ref)

    np.testing.assert_allclose(np.asarray(out), np.asarray(ref), rtol=1e-3, atol=1e-3)
    print("KERNEL_OK")
</pallas_src>

<mosaic_0001>
module attributes {stable_mosaic.version = 11 : i64} {
  func.func @kernel(%arg0: i32, %arg1: memref<1x16x64xf32, #tpu.memory_space<vmem>>, %arg2: memref<1x128x64xf32, #tpu.memory_space<vmem>>, %arg3: memref<1x4x16x16xf32, #tpu.memory_space<vmem>>, %arg4: memref<64x64xf32, #tpu.memory_space<vmem>>, %arg5: memref<64x256xf32, #tpu.memory_space<vmem>>, %arg6: memref<64x64xf32, #tpu.memory_space<vmem>>, %arg7: memref<64x64xf32, #tpu.memory_space<vmem>>, %arg8: memref<64x64xf32, #tpu.memory_space<vmem>>, %arg9: memref<1x64xf32, #tpu.memory_space<vmem>>, %arg10: memref<1x64xf32, #tpu.memory_space<vmem>>, %arg11: memref<1x16x64xf32, #tpu.memory_space<vmem>>) attributes {dimension_semantics = [#tpu.dimension_semantics<parallel>], iteration_bounds = array<i64: 2>, scalar_prefetch = 0 : i64, scratch_operands = 0 : i64, tpu.core_type = #tpu.core_type<tc>, window_params = [{transform_indices = @transform_0, window_bounds = array<i64: 1, 16, 64>}, {transform_indices = @transform_1, window_bounds = array<i64: 1, 128, 64>}, {transform_indices = @transform_2, window_bounds = array<i64: 1, 4, 16, 16>}, {pipeline_mode = #tpu.pipeline_mode<synchronous>, transform_indices = @transform_3, window_bounds = array<i64: 64, 64>}, {pipeline_mode = #tpu.pipeline_mode<synchronous>, transform_indices = @transform_4, window_bounds = array<i64: 64, 256>}, {pipeline_mode = #tpu.pipeline_mode<synchronous>, transform_indices = @transform_5, window_bounds = array<i64: 64, 64>}, {pipeline_mode = #tpu.pipeline_mode<synchronous>, transform_indices = @transform_6, window_bounds = array<i64: 64, 64>}, {pipeline_mode = #tpu.pipeline_mode<synchronous>, transform_indices = @transform_7, window_bounds = array<i64: 64, 64>}, {pipeline_mode = #tpu.pipeline_mode<synchronous>, transform_indices = @transform_8, window_bounds = array<i64: 1, 64>}, {pipeline_mode = #tpu.pipeline_mode<synchronous>, transform_indices = @transform_9, window_bounds = array<i64: 1, 64>}, {transform_indices = @transform_10, window_bounds = array<i64: 1, 16, 64>}]} {
    %c0 = arith.constant 0 : index
    %c0_0 = arith.constant 0 : index
    %c0_1 = arith.constant 0 : index
    %0 = vector.load %arg1[%c0, %c0_0, %c0_1] : memref<1x16x64xf32, #tpu.memory_space<vmem>>, vector<1x16x64xf32>
    %1 = vector.shape_cast %0 : vector<1x16x64xf32> to vector<16x64xf32>
    %c0_2 = arith.constant 0 : index
    %c0_3 = arith.constant 0 : index
    %c0_4 = arith.constant 0 : index
    %2 = vector.load %arg2[%c0_2, %c0_3, %c0_4] : memref<1x128x64xf32, #tpu.memory_space<vmem>>, vector<1x128x64xf32>
    %3 = vector.shape_cast %2 : vector<1x128x64xf32> to vector<128x64xf32>
    %c0_5 = arith.constant 0 : index
    %c0_6 = arith.constant 0 : index
    %4 = vector.load %arg4[%c0_5, %c0_6] : memref<64x64xf32, #tpu.memory_space<vmem>>, vector<64x64xf32>
    %cst = arith.constant dense<0.000000e+00> : vector<16x64xf32>
    %5 = tpu.matmul %1, %4, %cst {dimension_numbers = #tpu.dot_dimension_numbers<[1], [0], [0], [1], [0, 0, 1, 1], [], []>} : vector<16x64xf32>, vector<64x64xf32>, vector<16x64xf32> -> vector<16x64xf32>
    %c0_7 = arith.constant 0 : index
    %c0_8 = arith.constant 0 : index
    %6 = vector.load %arg5[%c0_7, %c0_8] : memref<64x256xf32, #tpu.memory_space<vmem>>, vector<64x256xf32>
    %cst_9 = arith.constant dense<0.000000e+00> : vector<128x256xf32>
    %7 = tpu.matmul %3, %6, %cst_9 {dimension_numbers = #tpu.dot_dimension_numbers<[1], [0], [0], [1], [0, 0, 1, 1], [], []>} : vector<128x64xf32>, vector<64x256xf32>, vector<128x256xf32> -> vector<128x256xf32>
    %8 = vector.extract_strided_slice %7 {offsets = [0, 0], sizes = [128, 128], strides = [1, 1]} : vector<128x256xf32> to vector<128x128xf32>
    %9 = vector.extract_strided_slice %7 {offsets = [0, 128], sizes = [128, 128], strides = [1, 1]} : vector<128x256xf32> to vector<128x128xf32>
    %10 = arith.mulf %8, %9 : vector<128x128xf32>
    %11 = vector.shape_cast %10 : vector<128x128xf32> to vector<1x16x8x128xf32>
    %cst_10 = arith.constant dense<0.000000e+00> : vector<1x16x128xf32>
    %12 = vector.multi_reduction <add>, %11, %cst_10 [2] : vector<1x16x8x128xf32> to vector<1x16x128xf32>
    %cst_11 = arith.constant 0.353553385 : f32
    %13 = vector.broadcast %cst_11 : f32 to vector<1x16x128xf32>
    %14 = arith.mulf %12, %13 : vector<1x16x128xf32>
    %15 = vector.extract_strided_slice %14 {offsets = [0, 0, 0], sizes = [1, 16, 64], strides = [1, 1, 1]} : vector<1x16x128xf32> to vector<1x16x64xf32>
    %16 = vector.extract_strided_slice %14 {offsets = [0, 0, 64], sizes = [1, 16, 64], strides = [1, 1, 1]} : vector<1x16x128xf32> to vector<1x16x64xf32>
    %17 = vector.shape_cast %5 : vector<16x64xf32> to vector<1x16x64xf32>
    %18 = tpu.transpose %15, [0, 2, 1] : vector<1x16x64xf32> -> vector<1x64x16xf32>
    %19 = tpu.concatenate %18, %18, %18, %18 in 2 : vector<1x64x16xf32>, vector<1x64x16xf32>, vector<1x64x16xf32>, vector<1x64x16xf32> -> vector<1x64x64xf32>
    %c0_12 = arith.constant 0 : index
    %c0_13 = arith.constant 0 : index
    %20 = vector.load %arg7[%c0_12, %c0_13] : memref<64x64xf32, #tpu.memory_space<vmem>>, vector<64x64xf32>
    %21 = vector.shape_cast %20 : vector<64x64xf32> to vector<1x64x64xf32>
    %22 = arith.mulf %19, %21 : vector<1x64x64xf32>
    %23 = tpu.concatenate %16, %16, %16, %16 in 1 : vector<1x16x64xf32>, vector<1x16x64xf32>, vector<1x16x64xf32>, vector<1x16x64xf32> -> vector<1x64x64xf32>
    %c0_14 = arith.constant 0 : index
    %c0_15 = arith.constant 0 : index
    %24 = vector.load %arg8[%c0_14, %c0_15] : memref<64x64xf32, #tpu.memory_space<vmem>>, vector<64x64xf32>
    %25 = vector.shape_cast %24 : vector<64x64xf32> to vector<1x64x64xf32>
    %26 = arith.mulf %23, %25 : vector<1x64x64xf32>
    "tpu.trace_start"() <{level = 10 : i32, message = "bqd,bdc->bqc"}> : () -> ()
    %cst_16 = arith.constant dense<0.000000e+00> : vector<1x16x64xf32>
    %27 = tpu.matmul %17, %22, %cst_16 {dimension_numbers = #tpu.dot_dimension_numbers<[2], [1], [1], [2], [0, 0, 0, 1, 1, 2], [0], [0]>} : vector<1x16x64xf32>, vector<1x64x64xf32>, vector<1x16x64xf32> -> vector<1x16x64xf32>
    "tpu.trace_stop"() : () -> ()
    %c0_17 = arith.constant 0 : index
    %c0_18 = arith.constant 0 : index
    %c0_19 = arith.constant 0 : index
    %c0_20 = arith.constant 0 : index
    %28 = vector.load %arg3[%c0_17, %c0_18, %c0_19, %c0_20] : memref<1x4x16x16xf32, #tpu.memory_space<vmem>>, vector<1x4x16x16xf32>
    %29 = vector.extract_strided_slice %28 {offsets = [0, 0, 0, 0], sizes = [1, 1, 16, 16], strides = [1, 1, 1, 1]} : vector<1x4x16x16xf32> to vector<1x1x16x16xf32>
    %30 = vector.shape_cast %29 : vector<1x1x16x16xf32> to vector<1x16x16xf32>
    %31 = vector.extract_strided_slice %28 {offsets = [0, 1, 0, 0], sizes = [1, 1, 16, 16], strides = [1, 1, 1, 1]} : vector<1x4x16x16xf32> to vector<1x1x16x16xf32>
    %32 = vector.shape_cast %31 : vector<1x1x16x16xf32> to vector<1x16x16xf32>
    %33 = vector.extract_strided_slice %28 {offsets = [0, 2, 0, 0], sizes = [1, 1, 16, 16], strides = [1, 1, 1, 1]} : vector<1x4x16x16xf32> to vector<1x1x16x16xf32>
    %34 = vector.shape_cast %33 : vector<1x1x16x16xf32> to vector<1x16x16xf32>
    %35 = vector.extract_strided_slice %28 {offsets = [0, 3, 0, 0], sizes = [1, 1, 16, 16], strides = [1, 1, 1, 1]} : vector<1x4x16x16xf32> to vector<1x1x16x16xf32>
    %36 = vector.shape_cast %35 : vector<1x1x16x16xf32> to vector<1x16x16xf32>
    %37 = tpu.concatenate %30, %32, %34, %36 in 2 : vector<1x16x16xf32>, vector<1x16x16xf32>, vector<1x16x16xf32>, vector<1x16x16xf32> -> vector<1x16x64xf32>
    %38 = arith.addf %27, %37 : vector<1x16x64xf32>
    %39 = vector.extract_strided_slice %38 {offsets = [0, 0, 0], sizes = [1, 16, 16], strides = [1, 1, 1]} : vector<1x16x64xf32> to vector<1x16x16xf32>
    %cst_21 = arith.constant dense<0xFF800000> : vector<1x16xf32>
    %40 = vector.multi_reduction <maximumf>, %39, %cst_21 [2] : vector<1x16x16xf32> to vector<1x16xf32>
    %41 = vector.shape_cast %40 : vector<1x16xf32> to vector<1x16x1xf32>
    %42 = vector.shape_cast %41 : vector<1x16x1xf32> to vector<1x16x1xf32>
    %43 = vector.broadcast %42 : vector<1x16x1xf32> to vector<1x16x16xf32>
    %44 = vector.extract_strided_slice %38 {offsets = [0, 0, 16], sizes = [1, 16, 16], strides = [1, 1, 1]} : vector<1x16x64xf32> to vector<1x16x16xf32>
    %cst_22 = arith.constant dense<0xFF800000> : vector<1x16xf32>
    %45 = vector.multi_reduction <maximumf>, %44, %cst_22 [2] : vector<1x16x16xf32> to vector<1x16xf32>
    %46 = vector.shape_cast %45 : vector<1x16xf32> to vector<1x16x1xf32>
    %47 = vector.shape_cast %46 : vector<1x16x1xf32> to vector<1x16x1xf32>
    %48 = vector.broadcast %47 : vector<1x16x1xf32> to vector<1x16x16xf32>
    %49 = vector.extract_strided_slice %38 {offsets = [0, 0, 32], sizes = [1, 16, 16], strides = [1, 1, 1]} : vector<1x16x64xf32> to vector<1x16x16xf32>
    %cst_23 = arith.constant dense<0xFF800000> : vector<1x16xf32>
    %50 = vector.multi_reduction <maximumf>, %49, %cst_23 [2] : vector<1x16x16xf32> to vector<1x16xf32>
    %51 = vector.shape_cast %50 : vector<1x16xf32> to vector<1x16x1xf32>
    %52 = vector.shape_cast %51 : vector<1x16x1xf32> to vector<1x16x1xf32>
    %53 = vector.broadcast %52 : vector<1x16x1xf32> to vector<1x16x16xf32>
    %54 = vector.extract_strided_slice %38 {offsets = [0, 0, 48], sizes = [1, 16, 16], strides = [1, 1, 1]} : vector<1x16x64xf32> to vector<1x16x16xf32>
    %cst_24 = arith.constant dense<0xFF800000> : vector<1x16xf32>
    %55 = vector.multi_reduction <maximumf>, %54, %cst_24 [2] : vector<1x16x16xf32> to vector<1x16xf32>
    %56 = vector.shape_cast %55 : vector<1x16xf32> to vector<1x16x1xf32>
    %57 = vector.shape_cast %56 : vector<1x16x1xf32> to vector<1x16x1xf32>
    %58 = vector.broadcast %57 : vector<1x16x1xf32> to vector<1x16x16xf32>
    %59 = tpu.concatenate %43, %48, %53, %58 in 2 : vector<1x16x16xf32>, vector<1x16x16xf32>, vector<1x16x16xf32>, vector<1x16x16xf32> -> vector<1x16x64xf32>
    %60 = arith.subf %38, %59 : vector<1x16x64xf32>
    %61 = math.exp %60 : vector<1x16x64xf32>
    "tpu.trace_start"() <{level = 10 : i32, message = "bqc,bcd->bqd"}> : () -> ()
    %cst_25 = arith.constant dense<0.000000e+00> : vector<1x16x64xf32>
    %62 = tpu.matmul %61, %26, %cst_25 {dimension_numbers = #tpu.dot_dimension_numbers<[2], [1], [1], [2], [0, 0, 0, 1, 1, 2], [0], [0]>} : vector<1x16x64xf32>, vector<1x64x64xf32>, vector<1x16x64xf32> -> vector<1x16x64xf32>
    "tpu.trace_stop"() : () -> ()
    %63 = vector.shape_cast %61 : vector<1x16x64xf32> to vector<16x64xf32>
    %c0_26 = arith.constant 0 : index
    %c0_27 = arith.constant 0 : index
    %64 = vector.load %arg8[%c0_26, %c0_27] : memref<64x64xf32, #tpu.memory_space<vmem>>, vector<64x64xf32>
    %cst_28 = arith.constant dense<0.000000e+00> : vector<16x64xf32>
    %65 = tpu.matmul %63, %64, %cst_28 {dimension_numbers = #tpu.dot_dimension_numbers<[1], [0], [0], [1], [0, 0, 1, 1], [], []>} : vector<16x64xf32>, vector<64x64xf32>, vector<16x64xf32> -> vector<16x64xf32>
    %66 = vector.shape_cast %65 : vector<16x64xf32> to vector<1x16x64xf32>
    %67 = tpu.reciprocal %66 : vector<1x16x64xf32> -> vector<1x16x64xf32>
    %68 = arith.mulf %62, %67 : vector<1x16x64xf32>
    %69 = vector.shape_cast %68 : vector<1x16x64xf32> to vector<16x64xf32>
    %cst_29 = arith.constant dense<0.000000e+00> : vector<16xf32>
    %70 = vector.multi_reduction <add>, %69, %cst_29 [1] : vector<16x64xf32> to vector<16xf32>
    %71 = vector.shape_cast %70 : vector<16xf32> to vector<16x1xf32>
    %cst_30 = arith.constant 6.400000e+01 : f32
    %72 = vector.broadcast %cst_30 : f32 to vector<16x1xf32>
    %73 = arith.divf %71, %72 : vector<16x1xf32>
    %74 = vector.broadcast %73 : vector<16x1xf32> to vector<16x64xf32>
    %75 = arith.subf %69, %74 : vector<16x64xf32>
    %76 = arith.mulf %75, %75 : vector<16x64xf32>
    %cst_31 = arith.constant dense<0.000000e+00> : vector<16xf32>
    %77 = vector.multi_reduction <add>, %76, %cst_31 [1] : vector<16x64xf32> to vector<16xf32>
    %78 = vector.shape_cast %77 : vector<16xf32> to vector<16x1xf32>
    %cst_32 = arith.constant 6.400000e+01 : f32
    %79 = vector.broadcast %cst_32 : f32 to vector<16x1xf32>
    %80 = arith.divf %78, %79 : vector<16x1xf32>
    %cst_33 = arith.constant 9.99999974E-6 : f32
    %81 = vector.broadcast %cst_33 : f32 to vector<16x1xf32>
    %82 = arith.addf %80, %81 : vector<16x1xf32>
    %83 = math.rsqrt %82 : vector<16x1xf32>
    %84 = vector.broadcast %83 : vector<16x1xf32> to vector<16x64xf32>
    %85 = arith.mulf %75, %84 : vector<16x64xf32>
    %c0_34 = arith.constant 0 : index
    %c0_35 = arith.constant 0 : index
    %86 = vector.load %arg9[%c0_34, %c0_35] : memref<1x64xf32, #tpu.memory_space<vmem>>, vector<1x64xf32>
    %87 = vector.broadcast %86 : vector<1x64xf32> to vector<16x64xf32>
    %88 = arith.mulf %85, %87 : vector<16x64xf32>
    %c0_36 = arith.constant 0 : index
    %c0_37 = arith.constant 0 : index
    %89 = vector.load %arg10[%c0_36, %c0_37] : memref<1x64xf32, #tpu.memory_space<vmem>>, vector<1x64xf32>
    %90 = vector.broadcast %89 : vector<1x64xf32> to vector<16x64xf32>
    %91 = arith.addf %88, %90 : vector<16x64xf32>
    %c0_38 = arith.constant 0 : index
    %c0_39 = arith.constant 0 : index
    %92 = vector.load %arg6[%c0_38, %c0_39] : memref<64x64xf32, #tpu.memory_space<vmem>>, vector<64x64xf32>
    %cst_40 = arith.constant dense<0.000000e+00> : vector<16x64xf32>
    %93 = tpu.matmul %91, %92, %cst_40 {dimension_numbers = #tpu.dot_dimension_numbers<[1], [0], [0], [1], [0, 0, 1, 1], [], []>} : vector<16x64xf32>, vector<64x64xf32>, vector<16x64xf32> -> vector<16x64xf32>
    %94 = vector.shape_cast %93 : vector<16x64xf32> to vector<1x16x64xf32>
    %c0_41 = arith.constant 0 : index
    %c0_42 = arith.constant 0 : index
    %c0_43 = arith.constant 0 : index
    %95 = vector.load %arg11[%c0_41, %c0_42, %c0_43] : memref<1x16x64xf32, #tpu.memory_space<vmem>>, vector<1x16x64xf32>
    tpu.vector_store %arg11[%c0_41, %c0_42, %c0_43], %94 {strides = array<i32>} : memref<1x16x64xf32, #tpu.memory_space<vmem>>, vector<1x16x64xf32>,
    return
  }
  func.func @transform_0(%arg0: i32) -> (i32, i32, i32) {
    %c0_i32 = arith.constant 0 : i32
    %c0_i32_0 = arith.constant 0 : i32
    %c0_i32_1 = arith.constant 0 : i32
    return %arg0, %c0_i32, %c0_i32_0 : i32, i32, i32
  }
  func.func @transform_1(%arg0: i32) -> (i32, i32, i32) {
    %c0_i32 = arith.constant 0 : i32
    %c0_i32_0 = arith.constant 0 : i32
    %c0_i32_1 = arith.constant 0 : i32
    return %arg0, %c0_i32, %c0_i32_0 : i32, i32, i32
  }
  func.func @transform_2(%arg0: i32) -> (i32, i32, i32, i32) {
    %c0_i32 = arith.constant 0 : i32
    %c0_i32_0 = arith.constant 0 : i32
    %c0_i32_1 = arith.constant 0 : i32
    %c0_i32_2 = arith.constant 0 : i32
    return %arg0, %c0_i32, %c0_i32_0, %c0_i32_1 : i32, i32, i32, i32
  }
  func.func @transform_3(%arg0: i32) -> (i32, i32) {
    %c0_i32 = arith.constant 0 : i32
    %c0_i32_0 = arith.constant 0 : i32
    %c0_i32_1 = arith.constant 0 : i32
    return %c0_i32, %c0_i32_0 : i32, i32
  }
  func.func @transform_4(%arg0: i32) -> (i32, i32) {
    %c0_i32 = arith.constant 0 : i32
    %c0_i32_0 = arith.constant 0 : i32
    %c0_i32_1 = arith.constant 0 : i32
    return %c0_i32, %c0_i32_0 : i32, i32
  }
  func.func @transform_5(%arg0: i32) -> (i32, i32) {
    %c0_i32 = arith.constant 0 : i32
    %c0_i32_0 = arith.constant 0 : i32
    %c0_i32_1 = arith.constant 0 : i32
    return %c0_i32, %c0_i32_0 : i32, i32
  }
  func.func @transform_6(%arg0: i32) -> (i32, i32) {
    %c0_i32 = arith.constant 0 : i32
    %c0_i32_0 = arith.constant 0 : i32
    %c0_i32_1 = arith.constant 0 : i32
    return %c0_i32, %c0_i32_0 : i32, i32
  }
  func.func @transform_7(%arg0: i32) -> (i32, i32) {
    %c0_i32 = arith.constant 0 : i32
    %c0_i32_0 = arith.constant 0 : i32
    %c0_i32_1 = arith.constant 0 : i32
    return %c0_i32, %c0_i32_0 : i32, i32
  }
  func.func @transform_8(%arg0: i32) -> (i32, i32) {
    %c0_i32 = arith.constant 0 : i32
    %c0_i32_0 = arith.constant 0 : i32
    %c0_i32_1 = arith.constant 0 : i32
    return %c0_i32, %c0_i32_0 : i32, i32
  }
  func.func @transform_9(%arg0: i32) -> (i32, i32) {
    %c0_i32 = arith.constant 0 : i32
    %c0_i32_0 = arith.constant 0 : i32
    %c0_i32_1 = arith.constant 0 : i32
    return %c0_i32, %c0_i32_0 : i32, i32
  }
  func.func @transform_10(%arg0: i32) -> (i32, i32, i32) {
    %c0_i32 = arith.constant 0 : i32
    %c0_i32_0 = arith.constant 0 : i32
    %c0_i32_1 = arith.constant 0 : i32
    return %arg0, %c0_i32, %c0_i32_0 : i32, i32, i32
  }
}

</mosaic_0001>

<bundles_post_ra>
// kernel: tpu_custom_call.1
= control target key start
LH: loop header
LB: loop body
LE: loop exit
PB: predicated region body
PF: predicated region fallthrough
CT: control target
= control target key end

     0   :  { %s2891_s0 = inlined_call_operand.hbm [shape: f32[2,16,64], index: 0, kind: input, shape index: {}]   ;;  %s2892_s1 = inlined_call_operand.vmem [shape: f32[2,128,64], index: 1, kind: input, shape index: {}]   ;;  %s2893_s2 = inlined_call_operand.vmem [shape: f32[2,4,16,16], index: 2, kind: input, shape index: {}]   ;;  %s2894_s3 = inlined_call_operand.vmem [shape: f32[64,64], index: 3, kind: input, shape index: {}]   ;;  %s2895_s4 = inlined_call_operand.vmem [shape: f32[64,256], index: 4, kind: input, shape index: {}]   ;;  %s2896_s5 = inlined_call_operand.vmem [shape: f32[64,64], index: 5, kind: input, shape index: {}]   ;;  %s2897_s6 = inlined_call_operand.hbm [shape: f32[64,64], index: 6, kind: input, shape index: {}]   ;;  %s2898_s7 = inlined_call_operand.hbm [shape: f32[64,64], index: 7, kind: input, shape index: {}]   ;;  %s2899_s8 = inlined_call_operand.vmem [shape: f32[1,64], index: 8, kind: input, shape index: {}]   ;;  %s2900_s9 = inlined_call_operand.vmem [shape: f32[1,64], index: 9, kind: input, shape index: {}]   ;;  %s2901_s10 = inlined_call_operand.hbm [shape: f32[2,16,64], index: 10, kind: output, shape index: {}]  }
   0x1   :  { %2909 = sst [smem:[#allocation14_spill]] %s2897_s6 }
   0x2   :  { %2910 = sst [smem:[#allocation15_spill]] %s2898_s7 }
   0x3   :  { %15 = vsyncpa [#allocation3], 0 }
   0x4   :  { %17 = vsyncpa [#allocation3 + $0x1], 0 }
   0x5   :  { %18 = vsyncpa [#allocation6], 0 }
   0x6   :  { %19 = vsyncpa [#allocation4], 0 }
   0x7   :  { %21 = vsyncpa [#allocation4 + $0x1], 0  ;;  %s2279_s13 = smov 0   ;;  %s2281_s14 = smov 0  }
   0x8   :  { %s2283_s15 = smov 0   ;;  %s2285_s16 = smov 0  }
   0x9 LB: > { %2911 = sst [smem:[#allocation12_spill]] %s2205_s15  ;;  %s2300_s17 = sadd.s32 4294967295, %s2209_s16   ;;  %s2209_s16 = sphi %s2285_s16, %s2934_s16   ;;  %s2205_s15 = sphi %s2283_s15, %s2931_s15   ;;  %s2201_s14 = sphi %s2281_s14, %s2933_s14   ;;  %s2197_s13 = sphi %s2279_s13, %s2932_s13  }
   0xa   : > { %s1774_s18 = sadd.s32 4294967294, %s2209_s16   ;;  %p47_p0 = scmp.ne.s32.totalorder %s2201_s14, %s2197_s13 }
   0xb   : > { %p2904_p1 = scmp.eq.s32.totalorder %s2300_s17, 0  ;;  %p270_p2 = scmp.eq.s32.totalorder %s2300_s17, 1 }
   0xc   : > { %p276_p3 = scmp.eq.s32.totalorder %s1774_s18, 1  ;;  %p1775_p5 = scmp.ge.s32.totalorder %s2209_s16, 1 }
   0xd   : > { %p2309_p4 = por %p2904_p1, %p47_p0  ;;  %p283_p7 = scmp.lt.s32.totalorder %s2209_s16, 3 }
   0xe   : > { %p2314_p6 = por %p276_p3, %p47_p0  ;;  %s2211_s22 = smov [#allocation5]  }
   0xf   : > { %s2912_s19 = scalar_select %p2309_p4, 1, 0 }
  0x10   : > { %s2913_s20 = scalar_select %p2314_p6, 1, 0 }
  0x11   : > { %p2319_p8 = pnand %p1775_p5, %p283_p7  ;;  %s304_s23 = sshll.u32 %s2211_s22, 4  ;;  %s305_s23 = int_to_ptr.vmem [resolvable:$true] %s304_s23 }
  0x12   : > { %s2212_s25 = smov [#allocation7]   ;;  %s2072_s27 = scalar_lea.vmem %s305_s23, 1024 }
  0x13   : > { %s2914_s21 = scalar_select %p2319_p8, 1, 0 }
  0x14   : > { %p1985_p9 = pneg %p2319_p8  ;;  %s317_s26 = sshll.u32 %s2212_s25, 4  ;;  %s318_s26 = int_to_ptr.vmem [resolvable:$true] %s317_s26 }
  0x15   : > { %p2073_p13 = scmp.ne.s32.totalorder %s305_s23, %s2072_s27  ;;  %p2080_p5 = scmp.lt.s32.totalorder %s305_s23, %s305_s23 }
  0x16   : > { %p2328_p11 = pnand %p1985_p9, %p2904_p1  ;;  %p2081_p7 = scmp.lt.s32.totalorder %s2072_s27, %s2072_s27 }
  0x18   : > { %p2063_p12 = pneg %p2328_p11  ;;  %p2082_p10 = por %p2081_p7, %p2080_p5 }
  0x1a   : > { %p2075_p0 = pnand %p2073_p13, %p2063_p12 }
  0x1c   : > { %p2076_p3 = pneg %p2075_p0 }
  0x1e   : > { %p2083_p9 = pnand %p2082_p10, %p2076_p3 }
  0x20   : > { %2086 = shalt.err (!%p2083_p9)
}
  0x21   : > { %s2902_s28 = smov 128   ;;  %s2903_s29 = smov 8  }
  0x22   : > { %s2916_s6 = sld [smem:[#allocation14_spill]]  ;;  %s2098_s12 = scalar_lea.vmem %s318_s26, 1024 }
  0x23   : > { %p2099_p13 = scmp.ne.s32.totalorder %s318_s26, %s2098_s12  ;;  %p2106_p10 = scmp.lt.s32.totalorder %s318_s26, %s318_s26 }
  0x24   : > { %p2107_p3 = scmp.lt.s32.totalorder %s2098_s12, %s2098_s12 }
  0x25   : > { %p2101_p0 = pnand %p2099_p13, %p2063_p12 }
  0x26   : > { %p2108_p7 = por %p2107_p3, %p2106_p10 }
  0x27   : > { %p2102_p5 = pneg %p2101_p0 }
  0x28   : > { %1988 = dma.hbm_to_vmem [thread:$0]  (!%p2328_p11), %s2916_s6, 1024, %s305_s23, [#allocation6], %s2902_s28, %s2902_s28, %s2903_s29  }
  0x29   : > { %p2109_p9 = pnand %p2108_p7, %p2102_p5 }
  0x2b   : > { %2112 = shalt.err (!%p2109_p9)
}
  0x2c   : > { %s2917_s7 = sld [smem:[#allocation15_spill]]  ;;  %s2357_s23 = sadd.s32 1, %s2209_s16  }
  0x2d   : > { %s34_s24 = sadd.s32 1, %s2205_s15  ;;  %s31_s25 = ssub.s32 %s2209_s16, %s2357_s23 }
  0x2e   : > { %p41_p12 = scmp.ne.s32.totalorder %s2205_s15, %s2201_s14  ;;  %p32_p13 = scmp.eq.s32.totalorder %s31_s25, 0 }
  0x2f   : > { %p42_p0 = scmp.eq.s32.totalorder %s2209_s16, 0  ;;  %p2002_p10 = scmp.lt.s32.totalorder %s2209_s16, 2 }
  0x30   : > { %p2367_p5 = por %p270_p2, %p41_p12  ;;  %s337_s11 = sand.u32 1, %s2205_s15  }
  0x31   : > { %s2373_s30 = scalar_select %p32_p13, %s2205_s15, %s34_s24  }
  0x32   : > { %1991 = dma.hbm_to_vmem [thread:$0]  (!%p2328_p11), %s2917_s7, 1024, %s318_s26, [#allocation6], %s2902_s28, %s2902_s28, %s2903_s29  }
  0x33   : > { %s2918_s27 = scalar_select %p2367_p5, 1, 0 }
  0x34   : > { %2919 = sst [smem:[#allocation13_spill]] %s2373_s30  ;;  %p43_p3 = por %p42_p0, %p41_p12 }
  0x35   : > { %s1779_s12 = sshll.u32 %s337_s11, 4  ;;  %s1824_s26 = sshll.u32 %s2209_s16, 8 }
  0x36   : > { %s2380_s28 = scalar_lea.hbm %s2891_s0, %s1824_s26  ;;  %s341_s25 = scalar_lea.vmem [#allocation2], %s1779_s12 }
  0x37   : > { %s348_s29 = sshll.u32 %s341_s25, 4  ;;  %p2384_p2 = pnand %p2002_p10, %p43_p3  ;;  %s2382_s29 = int_to_ptr.vmem [resolvable:$true] %s348_s29 }
  0x38   : > { %s2388_s24 = scalar_lea.sflag [#allocation3], %s337_s11  ;;  %s2113_s7 = scalar_lea.hbm %s2380_s28, 256 }
  0x39   : > { %p2114_p11 = scmp.ne.s32.totalorder %s2380_s28, %s2113_s7  ;;  %p2115_p7 = pneg %p2384_p2 }
  0x3a   : > { %s2118_s12 = scalar_lea.hbm %s2891_s0, 512  ;;  %p2119_p13 = scmp.lt.s32.totalorder %s2380_s28, %s2891_s0 }
  0x3b   : > { %p2116_p9 = pnand %p2115_p7, %p2114_p11  ;;  %p2120_p0 = scmp.lt.s32.totalorder %s2118_s12, %s2113_s7 }
  0x3d   : > { %p2117_p12 = pneg %p2116_p9  ;;  %p2121_p10 = por %p2120_p0, %p2119_p13 }
  0x3f   : > { %p2122_p3 = pnand %p2121_p10, %p2117_p12 }
  0x41   : > { %2125 = shalt.err (!%p2122_p3)
}
  0x42   : > { %s2126_s11 = scalar_lea.vmem %s2382_s29, 256  ;;  %s2215_s30 = smov [#allocation2]  }
  0x43   : > { %p2127_p1 = scmp.ne.s32.totalorder %s2382_s29, %s2126_s11  ;;  %s2131_s15 = sshll.u32 %s2215_s30, 4  ;;  %s2132_s15 = int_to_ptr.vmem [resolvable:$false] %s2131_s15 }
  0x44   : > { %s2133_s26 = scalar_lea.vmem %s2132_s15, 512  ;;  %p2134_p9 = scmp.lt.s32.totalorder %s2382_s29, %s2132_s15 }
  0x45   : > { %p2129_p6 = pnand %p2127_p1, %p2115_p7  ;;  %p2135_p5 = scmp.lt.s32.totalorder %s2133_s26, %s2126_s11 }
  0x47   : > { %p2130_p11 = pneg %p2129_p6  ;;  %p2136_p4 = por %p2135_p5, %p2134_p9 }
  0x49   : > { %p2137_p8 = pnand %p2136_p4, %p2130_p11 }
  0x4b   : > { %2140 = shalt.err (!%p2137_p8)
}
  0x4c   : > { %s2921_s7 = smov 8   ;;  %s2922_s18 = smov 128  }
  0x4d   : > { %1995 = dma.hbm_to_vmem [thread:$0]  (!%p2384_p2), %s2380_s28, 256, %s2382_s29, %s2388_s24, %s2922_s18, %s2922_s18, %s2921_s7  }
  0x4e   : > { %p2923_p1 = scmp.ne.s32.totalorder %s2914_s21, 0 }
  0x4f   : > { %s2415_s30 = sand.u32 (!%p2923_p1), 1, %s2201_s14   ;;  %p2924_p4 = scmp.ne.s32.totalorder (!%p2923_p1), %s2912_s19, 0 }
  0x50   : > { %376 = sbr.rel (%p2923_p1) target bundleno = 1837 (0x72d), region = 60  ;;  %s1783_s15 = sshll.u32 (!%p2923_p1), %s2415_s30, 4 }
  0x51   : > { %s379_s12 = scalar_lea.sflag (!%p2923_p1), [#allocation3], %s2415_s30  ;;  %s2421_s6 = scalar_lea.vmem (!%p2923_p1), [#allocation2], %s1783_s15 }
  0x55   : > { %2184 = dma.done.wait (%p2924_p4), %s379_s12, 256  }
  0x56   : > { %2186 = vsyncadd (%p2924_p4), %s379_s12, 4294967040  ;;  %p2925_p6 = scmp.eq.s32.totalorder %s2300_s17, 0 }
  0x58   : > { %2188 = dma.done.wait (%p2925_p6), [#allocation6], 2048   ;;  %p2926_p8 = pmov %p2925_p6 }
  0x59   : > { %v2216_v0 = vmov 0.0   ;;  %v570_v1 = vld [vmem:[%s2895_s4 + $0x78] sm:$0xff]  ;;  %v569_v2 = vld [vmem:[%s2895_s4 + $0x70] sm:$0xff]  ;;  %v568_v3 = vld [vmem:[%s2895_s4 + $0x68] sm:$0xff]  ;;  %p437_p5 = scmp.lt.s32.totalorder %s2300_s17, 1  ;;  %vm473_vm0 = vcmask 523264  }
  0x5a   : > { %2190 = vsyncadd (%p2926_p8), [#allocation6], 4294965248  ;;  %683 = vmatprep.mubr.f32.mxu1 %v2216_v0  ;;  %635 = vmatprep.subr.mxu1 %v570_v1  ;;  %v567_v4 = vld [vmem:[%s2895_s4 + $0x60] sm:$0xff]  ;;  %v566_v5 = vld [vmem:[%s2895_s4 + $0x58] sm:$0xff]  ;;  %vm924_vm1 = vcmask 1041409   ;;  %vm926_vm2 = vcmask 1042434  }
  0x5b   : > { %636 = vmatpush1.msra.mxu1 %v569_v2  ;;  %v565_v6 = vld [vmem:[%s2895_s4 + $0x50] sm:$0xff]  ;;  %v564_v7 = vld [vmem:[%s2895_s4 + $0x48] sm:$0xff]  ;;  %s2455_s29 = scalar_select %p437_p5, %s2300_s17, 1  ;;  %v563_v8 = vld [vmem:[%s2895_s4 + $0x40] sm:$0xff]  ;;  %vm928_vm3 = vcmask 1043459   ;;  %vm930_vm4 = vcmask 1044484  }
  0x5c   : > { %637 = vmatprep.subr.mxu1 %v568_v3  ;;  %v562_v9 = vld [vmem:[%s2895_s4 + $0x38] sm:$0xff]  ;;  %v561_v10 = vld [vmem:[%s2895_s4 + $0x30] sm:$0xff]  ;;  %v560_v11 = vld [vmem:[%s2895_s4 + $0x28] sm:$0xff]  ;;  %vm932_vm5 = vcmask 1045509   ;;  %vm934_vm6 = vcmask 1046534   ;;  %vm936_vm7 = vcmask 1047559  }
  0x5d   : > { %638 = vmatpush1.msra.mxu1 %v567_v4  ;;  %s1825_s12 = sshll.u32 %s2455_s29, 7  ;;  %v559_v12 = vld [vmem:[%s2895_s4 + $0x20] sm:$0xff]  ;;  %v558_v13 = vld [vmem:[%s2895_s4 + $0x18] sm:$0xff]  ;;  %v557_v14 = vld [vmem:[%s2895_s4 + $0x10] sm:$0xff]  ;;  %s2217_s26 = smov 16   ;;  %vm1059_vm8 = vcmask 130048  }
  0x5e   : > { %639 = vmatprep.subr.mxu1 %v566_v5  ;;  %s2482_s7 = scalar_lea.vmem %s2892_s1, %s1825_s12  ;;  %v556_v15 = vld [vmem:[%s2895_s4 + $0x8] sm:$0xff]  ;;  %v555_v16 = vld [vmem:[%s2895_s4] sm:$0xff]  ;;  %s2219_s24 = smov 48   ;;  %vm1068_vm9 = vcmask 261120   ;;  %vm1077_vm10 = vcmask 392192   ;;  %vm1282_vm11 = vcmask 392448  }
  0x5f   : > { %640 = vmatpush1.msra.mxu1 %v565_v6  ;;  %v449_v17 = vld [vmem:[%s2482_s7] sm:$0xff]  ;;  %v450_v18 = vld [vmem:[%s2482_s7 + $0x8] sm:$0xff]  ;;  %v451_v19 = vld [vmem:[%s2482_s7 + $0x10] sm:$0xff]  ;;  %vm1289_vm12 = vcmask 523648   ;;  %vm1275_vm13 = vcmask 261248   ;;  %s1827_s21 = sshll.u32 %s2300_s17, 8 }
  0x60   : > { %641 = vmatprep.subr.mxu1 %v564_v7  ;;  %v452_v20 = vld [vmem:[%s2482_s7 + $0x18] sm:$0xff]  ;;  %v453_v21 = vld [vmem:[%s2482_s7 + $0x20] sm:$0xff]  ;;  %v454_v22 = vld [vmem:[%s2482_s7 + $0x28] sm:$0xff]  ;;  %s1645_s12 = scalar_lea.sflag [#allocation4], %s2415_s30  ;;  %p2927_p7 = scmp.ne.s32.totalorder %s2918_s27, 0 }
  0x61   : > { %642 = vmatpush1.msra.mxu1 %v563_v8  ;;  %v455_v23 = vld [vmem:[%s2482_s7 + $0x30] sm:$0xff]  ;;  %v456_v24 = vld [vmem:[%s2482_s7 + $0x38] sm:$0xff]  ;;  %v457_v25 = vld [vmem:[%s2482_s7 + $0x40] sm:$0xff]  ;;  %s2221_s17 = smov [#allocation8]  }
  0x62   : > { %643 = vmatprep.subr.mxu1 %v562_v9  ;;  %v458_v26 = vld [vmem:[%s2482_s7 + $0x48] sm:$0xff]  ;;  %v459_v27 = vld [vmem:[%s2482_s7 + $0x50] sm:$0xff]  ;;  %v460_v28 = vld [vmem:[%s2482_s7 + $0x58] sm:$0xff]  ;;  %s2145_s19 = sshll.u32 %s2221_s17, 4  ;;  %s2146_s19 = int_to_ptr.vmem [resolvable:$false] %s2145_s19 }
  0x63   : > { %644 = vmatpush1.msra.mxu1 %v561_v10  ;;  %v461_v29 = vld [vmem:[%s2482_s7 + $0x60] sm:$0xff]  ;;  %v462_v30 = vld [vmem:[%s2482_s7 + $0x68] sm:$0xff]  ;;  %v463_v31 = vld [vmem:[%s2482_s7 + $0x70] sm:$0xff]  ;;  %s2147_s22 = scalar_lea.vmem %s2146_s19, 512 }
  0x64   : > { %645 = vmatprep.subr.mxu1 %v560_v11  ;;  %v464_v32 = vld [vmem:[%s2482_s7 + $0x78] sm:$0xff]  ;;  %s1826_s7 = sshll.u32 %s2455_s29, 6  ;;  %s2220_s29 = smov 64  }
  0x65   : > { %646 = vmatpush1.msra.mxu1 %v559_v12  ;;  %s2613_s28 = scalar_lea.vmem %s2893_s2, %s1826_s7  ;;  %s436_s7 = scalar_lea.vmem [#allocation8], %s1783_s15 }
  0x66   : > { %647 = vmatprep.subr.mxu1 %v558_v13  ;;  %s1658_s18 = sshll.u32 %s436_s7, 4  ;;  %s2841_s18 = int_to_ptr.vmem [resolvable:$true] %s1658_s18 }
  0x67   : > { %648 = vmatpush1.msra.mxu1 %v557_v14  ;;  %s2141_s15 = scalar_lea.vmem %s2841_s18, 256  ;;  %p2148_p0 = scmp.lt.s32.totalorder %s2841_s18, %s2146_s19 }
  0x68   : > { %649 = vmatprep.subr.mxu1 %v556_v15  ;;  %p2142_p2 = scmp.ne.s32.totalorder %s2841_s18, %s2141_s15  ;;  %p2149_p10 = scmp.lt.s32.totalorder %s2147_s22, %s2141_s15 }
  0x69   : > { %650 = vmatpush1.msra.mxu1 %v555_v16 }
  0x6a   : > { %1793 = vmatmul.mubr.msk.f32.vlgmr.msra.gmra.mxu1 %vm473_vm0, %v449_v17  ;;  %p2143_p12 = pnand %p2142_p2, %p2927_p7  ;;  %p2150_p3 = por %p2149_p10, %p2148_p0 }
  0x6b   : > { %689 = vmatprep.mubr.f32.mxu1 %v2216_v0 }
  0x6c   : > { %p2144_p13 = pneg %p2143_p12 }
  0x6e   : > { %1794 = vmatmul.mubr.msk.f32.gmra.mxu1 %vm473_vm0, %v450_v18  ;;  %p2151_p11 = pnand %p2150_p3, %p2144_p13 }
  0x6f   : > { %695 = vmatprep.mubr.f32.mxu1 %v2216_v0 }
  0x72   : > { %1795 = vmatmul.mubr.msk.f32.gmra.mxu1 %vm473_vm0, %v451_v19 }
  0x73   : > { %701 = vmatprep.mubr.f32.mxu1 %v2216_v0 }
  0x76   : > { %1796 = vmatmul.mubr.msk.f32.gmra.mxu1 %vm473_vm0, %v452_v20 }
  0x77   : > { %707 = vmatprep.mubr.f32.mxu1 %v2216_v0 }
  0x7a   : > { %1797 = vmatmul.mubr.msk.f32.gmra.mxu1 %vm473_vm0, %v453_v21 }
  0x7b   : > { %713 = vmatprep.mubr.f32.mxu1 %v2216_v0 }
  0x7e   : > { %1798 = vmatmul.mubr.msk.f32.gmra.mxu1 %vm473_vm0, %v454_v22 }
  0x7f   : > { %719 = vmatprep.mubr.f32.mxu1 %v2216_v0 }
  0x82   : > { %1799 = vmatmul.mubr.msk.f32.gmra.mxu1 %vm473_vm0, %v455_v23 }
  0x83   : > { %725 = vmatprep.mubr.f32.mxu1 %v2216_v0 }
  0x86   : > { %1800 = vmatmul.mubr.msk.f32.gmra.mxu1 %vm473_vm0, %v456_v24 }
  0x87   : > { %731 = vmatprep.mubr.f32.mxu1 %v2216_v0 }
  0x8a   : > { %1801 = vmatmul.mubr.msk.f32.gmra.mxu1 %vm473_vm0, %v457_v25 }
  0x8b   : > { %737 = vmatprep.mubr.f32.mxu1 %v2216_v0 }
  0x8e   : > { %1802 = vmatmul.mubr.msk.f32.gmra.mxu1 %vm473_vm0, %v458_v26 }
  0x8f   : > { %743 = vmatprep.mubr.f32.mxu1 %v2216_v0 }
  0x92   : > { %1803 = vmatmul.mubr.msk.f32.gmra.mxu1 %vm473_vm0, %v459_v27 }
  0x93   : > { %749 = vmatprep.mubr.f32.mxu1 %v2216_v0 }
  0x96   : > { %1804 = vmatmul.mubr.msk.f32.gmra.mxu1 %vm473_vm0, %v460_v28 }
  0x97   : > { %755 = vmatprep.mubr.f32.mxu1 %v2216_v0 }
  0x9a   : > { %1805 = vmatmul.mubr.msk.f32.gmra.mxu1 %vm473_vm0, %v461_v29 }
  0x9b   : > { %761 = vmatprep.mubr.f32.mxu1 %v2216_v0 }
  0x9e   : > { %1806 = vmatmul.mubr.msk.f32.gmra.mxu1 %vm473_vm0, %v462_v30 }
  0x9f   : > { %767 = vmatprep.mubr.f32.mxu1 %v2216_v0 }
  0xa2   : > { %1807 = vmatmul.mubr.msk.f32.gmra.mxu1 %vm473_vm0, %v463_v31 }
  0xa3   : > { %773 = vmatprep.mubr.f32.mxu1 %v2216_v0 }
  0xa6   : > { %1808 = vmatmul.mubr.msk.f32.gmra.mxu1 %vm473_vm0, %v464_v32 }
 0x12a   : > { %v685_v33 = vpop.f32.mrf.mxu1 }
 0x12c   : > { %v687_v34 = vpop.f32.mrf.mxu1 }
 0x12d   : > { %v780_v40 = vmul.f32 %v687_v34, %v685_v33 }
 0x12e   : > { %v691_v35 = vpop.f32.mrf.mxu1 }
 0x12f   : > { %v796_v46 = vrot.slane %v780_v40, 4 }
 0x130   : > { %v693_v36 = vpop.f32.mrf.mxu1 }
 0x131   : > { %v781_v38 = vmul.f32 %v693_v36, %v691_v35  ;;  %v797_v53 = vadd.f32 %v796_v46, %v780_v40 }
 0x132   : > { %v697_v37 = vpop.f32.mrf.mxu1 }
 0x133   : > { %v802_v43 = vrot.slane %v781_v38, 4  ;;  %v798_v61 = vrot.slane %v797_v53, 2 }
 0x134   : > { %v699_v39 = vpop.f32.mrf.mxu1 }
 0x135   : > { %v782_v41 = vmul.f32 %v699_v39, %v697_v37  ;;  %v803_v49 = vadd.f32 %v802_v43, %v781_v38  ;;  %v799_v7 = vadd.f32 %v798_v61, %v797_v53 }
 0x136   : > { %v703_v42 = vpop.f32.mrf.mxu1 }
 0x137   : > { %v808_v44 = vrot.slane %v782_v41, 4  ;;  %v804_v57 = vrot.slane %v803_v49, 2  ;;  %v800_v18 = vrot.slane %v799_v7, 1 }
 0x138   : > { %v705_v45 = vpop.f32.mrf.mxu1 }
 0x139   : > { %v783_v47 = vmul.f32 %v705_v45, %v703_v42  ;;  %v809_v51 = vadd.f32 %v808_v44, %v782_v41  ;;  %v805_v2 = vadd.f32 %v804_v57, %v803_v49  ;;  %v801_v31 = vadd.f32 %v800_v18, %v799_v7 }
 0x13a   : > { %v709_v48 = vpop.f32.mrf.mxu1 }
 0x13b   : > { %v814_v50 = vrot.slane %v783_v47, 4  ;;  %v810_v59 = vrot.slane %v809_v51, 2  ;;  %v806_v12 = vrot.slane %v805_v2, 1  ;;  %v892_v43 = vmul.f32 0.35355338, %v801_v31 }
 0x13c   : > { %v711_v52 = vpop.f32.mrf.mxu1 }
 0x13d   : > { %v784_v54 = vmul.f32 %v711_v52, %v709_v48  ;;  %v815_v55 = vadd.f32 %v814_v50, %v783_v47  ;;  %v811_v4 = vadd.f32 %v810_v59, %v809_v51  ;;  %v807_v24 = vadd.f32 %v806_v12, %v805_v2 }
 0x13e   : > { %v715_v56 = vpop.f32.mrf.mxu1 }
 0x13f   : > { %v820_v58 = vrot.slane %v784_v54, 4  ;;  %v816_v63 = vrot.slane %v815_v55, 2  ;;  %v812_v15 = vrot.slane %v811_v4, 1  ;;  %v893_v36 = vmul.f32 0.35355338, %v807_v24 }
 0x140   : > { %v717_v60 = vpop.f32.mrf.mxu1 }
 0x141   : > { %v821_v62 = vadd.f32 %v820_v58, %v784_v54  ;;  %v785_v0 = vmul.f32 %v717_v60, %v715_v56  ;;  %v817_v9 = vadd.f32 %v816_v63, %v815_v55  ;;  %v813_v28 = vadd.f32 %v812_v15, %v811_v4 }
 0x142   : > { %v721_v1 = vpop.f32.mrf.mxu1  ;;  %v925_v48 = vsel %vm924_vm1, %v893_v36, %v892_v43 }
 0x143   : > { %v822_v3 = vrot.slane %v821_v62, 2  ;;  %v826_v5 = vrot.slane %v785_v0, 4  ;;  %v818_v21 = vrot.slane %v817_v9, 1  ;;  %v894_v40 = vmul.f32 0.35355338, %v813_v28 }
 0x144   : > { %v723_v6 = vpop.f32.mrf.mxu1 }
 0x145   : > { %v786_v8 = vmul.f32 %v723_v6, %v721_v1  ;;  %v827_v10 = vadd.f32 %v826_v5, %v785_v0  ;;  %v823_v13 = vadd.f32 %v822_v3, %v821_v62  ;;  %v819_v34 = vadd.f32 %v818_v21, %v817_v9 }
 0x146   : > { %v727_v11 = vpop.f32.mrf.mxu1  ;;  %v927_v52 = vsel %vm926_vm2, %v894_v40, %v925_v48 }
 0x147   : > { %v832_v14 = vrot.slane %v786_v8, 4  ;;  %v828_v16 = vrot.slane %v827_v10, 2  ;;  %v824_v25 = vrot.slane %v823_v13, 1  ;;  %v895_v46 = vmul.f32 0.35355338, %v819_v34 }
 0x148   : > { %v729_v17 = vpop.f32.mrf.mxu1 }
 0x149   : > { %v833_v19 = vadd.f32 %v832_v14, %v786_v8  ;;  %v787_v20 = vmul.f32 %v729_v17, %v727_v11  ;;  %v829_v22 = vadd.f32 %v828_v16, %v827_v10  ;;  %v825_v37 = vadd.f32 %v824_v25, %v823_v13 }
 0x14a   : > { %v733_v23 = vpop.f32.mrf.mxu1  ;;  %v929_v59 = vsel %vm928_vm3, %v895_v46, %v927_v52 }
 0x14b   : > { %v834_v26 = vrot.slane %v833_v19, 2  ;;  %v838_v27 = vrot.slane %v787_v20, 4  ;;  %v830_v29 = vrot.slane %v829_v22, 1  ;;  %v896_v49 = vmul.f32 0.35355338, %v825_v37 }
 0x14c   : > { %v735_v30 = vpop.f32.mrf.mxu1 }
 0x14d   : > { %v835_v32 = vadd.f32 %v834_v26, %v833_v19  ;;  %v839_v33 = vadd.f32 %v838_v27, %v787_v20  ;;  %v831_v41 = vadd.f32 %v830_v29, %v829_v22  ;;  %v788_v57 = vmul.f32 %v735_v30, %v733_v23 }
 0x14e   : > { %v739_v35 = vpop.f32.mrf.mxu1  ;;  %v931_v61 = vsel %vm930_vm4, %v896_v49, %v929_v59 }
 0x14f   : > { %v836_v38 = vrot.slane %v835_v32, 1  ;;  %v840_v39 = vrot.slane %v839_v33, 2  ;;  %v897_v53 = vmul.f32 0.35355338, %v831_v41  ;;  %v844_v3 = vrot.slane %v788_v57, 4 }
 0x150   : > { %v741_v42 = vpop.f32.mrf.mxu1 }
 0x151   : > { %v837_v44 = vadd.f32 %v836_v38, %v835_v32  ;;  %v841_v45 = vadd.f32 %v840_v39, %v839_v33  ;;  %v789_v51 = vmul.f32 %v741_v42, %v739_v35  ;;  %v933_v2 = vsel %vm932_vm5, %v897_v53, %v931_v61 }
 0x152   : > { %v745_v47 = vpop.f32.mrf.mxu1  ;;  %v845_v12 = vadd.f32 %v844_v3, %v788_v57 }
 0x153   : > { %v842_v50 = vrot.slane %v841_v45, 1  ;;  %v898_v55 = vmul.f32 0.35355338, %v837_v44  ;;  %v850_v63 = vrot.slane %v789_v51, 4 }
 0x154   : > { %v747_v54 = vpop.f32.mrf.mxu1  ;;  %v846_v20 = vrot.slane %v845_v12, 2 }
 0x155   : > { %v843_v56 = vadd.f32 %v842_v50, %v841_v45  ;;  %v790_v58 = vmul.f32 %v747_v54, %v745_v47  ;;  %v935_v5 = vsel %vm934_vm6, %v898_v55, %v933_v2  ;;  %v851_v8 = vadd.f32 %v850_v63, %v789_v51 }
 0x156   : > { %v751_v60 = vpop.f32.mrf.mxu1  ;;  %v847_v30 = vadd.f32 %v846_v20, %v845_v12  ;;  %v472_v12 = vld [vmem:[%s2894_s3 + $0x38] sm:$0xff] }
 0x157   : > { %v899_v62 = vmul.f32 0.35355338, %v843_v56  ;;  %v856_v0 = vrot.slane %v790_v58, 4  ;;  %v852_v16 = vrot.slane %v851_v8, 2  ;;  %1878 = vmatprep.subr.mxu0 %v472_v12  ;;  %v468_v20 = vld [vmem:[%s2894_s3 + $0x18] sm:$0xff] }
 0x158   : > { %v753_v1 = vpop.f32.mrf.mxu1  ;;  %v848_v41 = vrot.slane %v847_v30, 1  ;;  %1879 = vmatpush3.msra.mxu0 %v472_v12 }
 0x159   : > { %v791_v4 = vmul.f32 %v753_v1, %v751_v60  ;;  %v2544_v6 = vsel %vm936_vm7, %v899_v62, %v935_v5  ;;  %v857_v10 = vadd.f32 %v856_v0, %v790_v58  ;;  %v853_v25 = vadd.f32 %v852_v16, %v851_v8 }
 0x15a   : > { %v757_v7 = vpop.f32.mrf.mxu1  ;;  %947 = vxpose.xlu0.b32.start [1/2] (short) (narrow) %v2544_v6, 64  ;;  %v849_v52 = vadd.f32 %v848_v41, %v847_v30 }
 0x15b   : > { %v862_v9 = vrot.slane %v791_v4, 4  ;;  %v858_v18 = vrot.slane %v857_v10, 2  ;;  %v854_v36 = vrot.slane %v853_v25, 1 }
 0x15c   : > { %v759_v11 = vpop.f32.mrf.mxu1  ;;  %v900_v62 = vmul.f32 0.35355338, %v849_v52 }
 0x15d   : > { %v863_v13 = vadd.f32 %v862_v9, %v791_v4  ;;  %v792_v14 = vmul.f32 %v759_v11, %v757_v7  ;;  %v859_v27 = vadd.f32 %v858_v18, %v857_v10  ;;  %v855_v47 = vadd.f32 %v854_v36, %v853_v25  ;;  %v470_v18 = vld [vmem:[%s2894_s3 + $0x28] sm:$0xff]  ;;  %v2631_v36 = vld [vmem:[#allocation7 + $0x38] sm:$0xff] }
 0x15e   : > { %v763_v15 = vpop.f32.mrf.mxu1  ;;  %v448_v25 = vld [vmem:[%s2421_s6 + $0x8] sm:$0xff] }
 0x15f   : > { %v868_v17 = vrot.slane %v792_v14, 4  ;;  %v864_v21 = vrot.slane %v863_v13, 2  ;;  %v860_v38 = vrot.slane %v859_v27, 1  ;;  %v901_v57 = vmul.f32 0.35355338, %v855_v47  ;;  %v2690_v47 = vld [vmem:[#allocation7 + $0x20] sm:$0xff] }
 0x160   : > { %v765_v19 = vpop.f32.mrf.mxu1 }
 0x161   : > { %v869_v22 = vadd.f32 %v868_v17, %v792_v14  ;;  %v793_v23 = vmul.f32 %v765_v19, %v763_v15  ;;  %v865_v31 = vadd.f32 %v864_v21, %v863_v13  ;;  %v861_v50 = vadd.f32 %v860_v38, %v859_v27  ;;  %v471_v17 = vld [vmem:[%s2894_s3 + $0x30] sm:$0xff]  ;;  %v469_v19 = vld [vmem:[%s2894_s3 + $0x20] sm:$0xff]  ;;  %v2643_v38 = vld [vmem:[#allocation7 + $0x18] sm:$0xff] }
 0x162   : > { %v769_v24 = vpop.f32.mrf.mxu1  ;;  %v938_v3 = vsel %vm924_vm1, %v901_v57, %v900_v62  ;;  %1880 = vmatprep.subr.mxu0 %v471_v17  ;;  %v467_v21 = vld [vmem:[%s2894_s3 + $0x10] sm:$0xff] }
 0x163   : > { %v870_v26 = vrot.slane %v869_v22, 2  ;;  %v874_v28 = vrot.slane %v793_v23, 4  ;;  %v866_v42 = vrot.slane %v865_v31, 1  ;;  %v902_v61 = vmul.f32 0.35355338, %v861_v50  ;;  %1881 = vmatpush3.msra.mxu0 %v471_v17 }
 0x164   : > { %v771_v29 = vpop.f32.mrf.mxu1  ;;  %1882 = vmatprep.subr.mxu0 %v470_v18 }
 0x165   : > { %v794_v32 = vmul.f32 %v771_v29, %v769_v24  ;;  %v871_v33 = vadd.f32 %v870_v26, %v869_v22  ;;  %v875_v34 = vadd.f32 %v874_v28, %v793_v23  ;;  %v867_v53 = vadd.f32 %v866_v42, %v865_v31  ;;  %1883 = vmatpush3.msra.mxu0 %v470_v18  ;;  %v466_v22 = vld [vmem:[%s2894_s3 + $0x8] sm:$0xff]  ;;  %v465_v23 = vld [vmem:[%s2894_s3] sm:$0xff] }
 0x166   : > { %v775_v35 = vpop.f32.mrf.mxu1  ;;  %v939_v7 = vsel %vm926_vm2, %v902_v61, %v938_v3  ;;  %1884 = vmatprep.subr.mxu0 %v469_v19  ;;  %v447_v24 = vld [vmem:[%s2421_s6] sm:$0xff]  ;;  %s2218_s6 = smov 32  }
 0x167   : > { %v880_v37 = vrot.slane %v794_v32, 4  ;;  %v876_v39 = vrot.slane %v875_v34, 2  ;;  %v872_v45 = vrot.slane %v871_v33, 1  ;;  %v903_v63 = vmul.f32 0.35355338, %v867_v53  ;;  %1885 = vmatpush3.msra.mxu0 %v469_v19  ;;  %1894 = vmatprep.mubr.msk.f32.mxu0 %vm473_vm0, %v447_v24 }
 0x168   : > { %v777_v40 = vpop.f32.mrf.mxu1  ;;  %1886 = vmatprep.subr.mxu0 %v468_v20 }
 0x169   : > { %v881_v43 = vadd.f32 %v880_v37, %v794_v32  ;;  %v795_v44 = vmul.f32 %v777_v40, %v775_v35  ;;  %v877_v46 = vadd.f32 %v876_v39, %v875_v34  ;;  %v873_v56 = vadd.f32 %v872_v45, %v871_v33  ;;  %1887 = vmatpush3.msra.mxu0 %v468_v20  ;;  %v1152_v33 = vld [vmem:[%s2613_s28 + $0x10] sm:$0xff]  ;;  %v1154_v34 = vld [vmem:[%s2613_s28 + $0x20] sm:$0xff]  ;;  %v2637_v37 = vld [vmem:[#allocation7 + $0x28] sm:$0xff] }
 0x16a   : > { %v940_v9 = vsel %vm928_vm3, %v903_v63, %v939_v7  ;;  %1888 = vmatprep.subr.mxu0 %v467_v21  ;;  %v1156_v35 = vld [vmem:[%s2613_s28 + $0x30] sm:$0xff]  ;;  %v2649_v39 = vld [vmem:[#allocation7 + $0x8] sm:$0xff]  ;;  %v1157_v45 = vld [vmem:[%s2613_s28 + $0x38] sm:$0xff] }
 0x16b   : > { %v882_v48 = vrot.slane %v881_v43, 2  ;;  %v886_v49 = vrot.slane %v795_v44, 4  ;;  %v878_v51 = vrot.slane %v877_v46, 1  ;;  %v904_v2 = vmul.f32 0.35355338, %v873_v56  ;;  %1889 = vmatpush3.msra.mxu0 %v467_v21 }
 0x16c   : > { %1890 = vmatprep.subr.mxu0 %v466_v22 }
 0x16d   : > { %v883_v54 = vadd.f32 %v882_v48, %v881_v43  ;;  %v887_v55 = vadd.f32 %v886_v49, %v795_v44  ;;  %v879_v58 = vadd.f32 %v878_v51, %v877_v46  ;;  %v941_v11 = vsel %vm930_vm4, %v904_v2, %v940_v9  ;;  %1891 = vmatpush3.msra.mxu0 %v466_v22  ;;  %v1153_v43 = vld [vmem:[%s2613_s28 + $0x18] sm:$0xff]  ;;  %v1155_v44 = vld [vmem:[%s2613_s28 + $0x28] sm:$0xff]  ;;  %v2686_v46 = vld [vmem:[#allocation7 + $0x30] sm:$0xff] }
 0x16e   : > { %1892 = vmatprep.subr.mxu0 %v465_v23  ;;  %v2694_v48 = vld [vmem:[#allocation7 + $0x10] sm:$0xff]  ;;  %v2698_v49 = vld [vmem:[#allocation7] sm:$0xff]  ;;  %v1093_v22 = vld [vmem:[#allocation5 + $0x38] sm:$0xff] }
 0x16f   : > { %v884_v59 = vrot.slane %v883_v54, 1  ;;  %v888_v60 = vrot.slane %v887_v55, 2  ;;  %v905_v4 = vmul.f32 0.35355338, %v879_v58  ;;  %1893 = vmatpush3.msra.mxu0 %v465_v23 }
 0x170   : > { %1895 = vmatmul.mubr.msk.f32.vlgmr.msra.gmra.mxu0 %vm473_vm0, %v448_v25 }
 0x171   : > { %v885_v0 = vadd.f32 %v884_v59, %v883_v54  ;;  %v889_v1 = vadd.f32 %v888_v60, %v887_v55  ;;  %v942_v14 = vsel %vm932_vm5, %v905_v4, %v941_v11  ;;  %v1150_v59 = vld [vmem:[%s2613_s28] sm:$0xff] }
 0x173   : > { %v890_v5 = vrot.slane %v889_v1, 1  ;;  %v906_v8 = vmul.f32 0.35355338, %v885_v0 }
 0x175   : > { %v891_v10 = vadd.f32 %v890_v5, %v889_v1  ;;  %v943_v15 = vsel %vm934_vm6, %v906_v8, %v942_v14 }
 0x177   : > { %v907_v13 = vmul.f32 0.35355338, %v891_v10 }
 0x179   : > { %v2557_v16 = vsel %vm936_vm7, %v907_v13, %v943_v15 }
 0x17a   : > { %948 = vxpose.xlu0.b32.end [2/2] (short) (narrow) %v2557_v16, 64 }
 0x1f2   : > { %v2585_v26 = vpop.trf.xlu0 }
 0x1f6   : > { %v2587_v27 = vpop.trf.xlu0 }
 0x1fa   : > { %v2589_v28 = vpop.trf.xlu0 }
 0x1fe   : > { %v2591_v29 = vpop.trf.xlu0 }
 0x202   : > { %v2593_v30 = vpop.trf.xlu0 }
 0x206   : > { %v2595_v31 = vpop.trf.xlu0 }
 0x207   : > { %997 = vrot.lane.b32.xlu1 %v2595_v31, %s2217_s26 }
 0x20a   : > { %v2599_v32 = vpop.trf.xlu0 }
 0x20b   : > { %1021 = vrot.lane.b32.xlu1 %v2595_v31, %s2218_s6  ;;  %999 = vrot.lane.b32.xlu0 %v2599_v32, %s2217_s26 }
 0x20e   : > { %v2661_v40 = vpop.trf.xlu0 }
 0x20f   : > { %995 = vrot.lane.b32.xlu1 %v2593_v30, %s2217_s26  ;;  %987 = vrot.lane.b32.xlu0 %v2585_v26, %s2217_s26 }
 0x213   : > { %1045 = vrot.lane.b32.xlu1 %v2595_v31, %s2219_s24  ;;  %1011 = vrot.lane.b32.xlu0 %v2585_v26, %s2218_s6 }
 0x217   : > { %1019 = vrot.lane.b32.xlu1 %v2593_v30, %s2218_s6  ;;  %1160 = vrot.lane.b32.xlu0 %v1152_v33, %s2217_s26  ;;  %v1092_v33 = vld [vmem:[#allocation5 + $0x30] sm:$0xff] }
 0x21b   : > { %993 = vrot.lane.b32.xlu1 %v2591_v29, %s2217_s26  ;;  %1168 = vrot.lane.b32.xlu0 %v1154_v34, %s2218_s6 }
 0x21f   : > { %1043 = vrot.lane.b32.xlu1 %v2593_v30, %s2219_s24  ;;  %1176 = vrot.lane.b32.xlu0 %v1156_v35, %s2219_s24 }
 0x223   : > { %1017 = vrot.lane.b32.xlu1 %v2591_v29, %s2218_s6  ;;  %1132 = vrot.lane.b32.xlu0 %v2631_v36, %s2220_s29 }
 0x227   : > { %991 = vrot.lane.b32.xlu1 %v2589_v28, %s2217_s26  ;;  %1128 = vrot.lane.b32.xlu0 %v2637_v37, %s2220_s29 }
 0x22b   : > { %1041 = vrot.lane.b32.xlu1 %v2591_v29, %s2219_s24  ;;  %1124 = vrot.lane.b32.xlu0 %v2643_v38, %s2220_s29 }
 0x22f   : > { %1015 = vrot.lane.b32.xlu1 %v2589_v28, %s2218_s6  ;;  %1120 = vrot.lane.b32.xlu0 %v2649_v39, %s2220_s29 }
 0x230   : > { %v2669_v41 = vpop.f32.mrf.mxu0 }
 0x232   : > { %v546_v42 = vpop.f32.mrf.mxu0 }
 0x233   : > { %989 = vrot.lane.b32.xlu1 %v2587_v27, %s2217_s26  ;;  %1913 = vmatprep.mubr.msk.f32.mxu0 %vm473_vm0, %v546_v42 }
 0x237   : > { %1023 = vrot.lane.b32.xlu1 %v2599_v32, %s2218_s6 }
 0x23b   : > { %1047 = vrot.lane.b32.xlu1 %v2599_v32, %s2219_s24 }
 0x23f   : > { %1001 = vrot.lane.b32.xlu1 %v2661_v40, %s2217_s26 }
 0x243   : > { %1025 = vrot.lane.b32.xlu1 %v2661_v40, %s2218_s6 }
 0x247   : > { %1049 = vrot.lane.b32.xlu1 %v2661_v40, %s2219_s24 }
 0x24b   : > { %1039 = vrot.lane.b32.xlu1 %v2589_v28, %s2219_s24 }
 0x24f   : > { %1013 = vrot.lane.b32.xlu1 %v2587_v27, %s2218_s6 }
 0x253   : > { %1037 = vrot.lane.b32.xlu1 %v2587_v27, %s2219_s24 }
 0x257   : > { %1035 = vrot.lane.b32.xlu1 %v2585_v26, %s2219_s24 }
 0x25b   : > { %1162 = vrot.lane.b32.xlu1 %v1153_v43, %s2217_s26  ;;  %v1091_v43 = vld [vmem:[#allocation5 + $0x28] sm:$0xff] }
 0x25f   : > { %1170 = vrot.lane.b32.xlu1 %v1155_v44, %s2218_s6 }
 0x263   : > { %1178 = vrot.lane.b32.xlu1 %v1157_v45, %s2219_s24 }
 0x267   : > { %1130 = vrot.lane.b32.xlu1 %v2686_v46, %s2220_s29 }
 0x26b   : > { %1126 = vrot.lane.b32.xlu1 %v2690_v47, %s2220_s29 }
 0x26f   : > { %1122 = vrot.lane.b32.xlu1 %v2694_v48, %s2220_s29 }
 0x273   : > { %1118 = vrot.lane.b32.xlu1 %v2698_v49, %s2220_s29 }
 0x279   : > { %v998_v50 = vpop.permute.xlu1 %997 }
 0x27d   : > { %v1022_v51 = vpop.permute.xlu1 %1021  ;;  %v1000_v52 = vpop.permute.xlu0 %999 }
 0x27e   : > { %v1066_v20 = vsel %vm1059_vm8, %v2599_v32, %v1000_v52 }
 0x281   : > { %v996_v53 = vpop.permute.xlu1 %995  ;;  %v988_v54 = vpop.permute.xlu0 %987 }
 0x282   : > { %v1060_v55 = vsel %vm1059_vm8, %v2585_v26, %v988_v54  ;;  %v1065_v26 = vsel %vm1059_vm8, %v2595_v31, %v998_v50  ;;  %v1090_v50 = vld [vmem:[#allocation5 + $0x20] sm:$0xff] }
 0x283   : > { %v1074_v32 = vsel %vm1068_vm9, %v1065_v26, %v1022_v51 }
 0x285   : > { %v1046_v56 = vpop.permute.xlu1 %1045  ;;  %v1012_v57 = vpop.permute.xlu0 %1011 }
 0x286   : > { %v2705_v58 = vsel %vm1068_vm9, %v1060_v55, %v1012_v57  ;;  %v1083_v44 = vsel %vm1077_vm10, %v1074_v32, %v1046_v56 }
 0x287   : > { %v1099_v51 = vmul.f32 %v1091_v43, %v1083_v44 }
 0x289   : > { %v1020_v60 = vpop.permute.xlu1 %1019  ;;  %v1161_v61 = vpop.permute.xlu0 %1160 }
 0x28a   : > { %v1182_v62 = vsel %vm1059_vm8, %v1150_v59, %v1161_v61 }
 0x28d   : > { %v994_v63 = vpop.permute.xlu1 %993  ;;  %v1169_v0 = vpop.permute.xlu0 %1168 }
 0x28e   : > { %v2710_v1 = vsel %vm1068_vm9, %v1182_v62, %v1169_v0  ;;  %v1063_v31 = vsel %vm1059_vm8, %v2591_v29, %v994_v63  ;;  %v1088_v29 = vld [vmem:[#allocation5 + $0x10] sm:$0xff] }
 0x291   : > { %v1044_v2 = vpop.permute.xlu1 %1043  ;;  %v2712_v3 = vpop.permute.xlu0 %1176 }
 0x295   : > { %v1018_v4 = vpop.permute.xlu1 %1017  ;;  %v1133_v5 = vpop.permute.xlu0 %1132 }
 0x296   : > { %v1149_v7 = vmul.f32 %v1133_v5, %v2557_v16  ;;  %v1072_v57 = vsel %vm1068_vm9, %v1063_v31, %v1018_v4  ;;  %v1186_v31 = vsel %vm1077_vm10, %v2710_v1, %v2712_v3 }
 0x298   : > { %1330 = vrot.lane.b32.xlu0 %v1149_v7, %s2220_s29 }
 0x299   : > { %v992_v8 = vpop.permute.xlu1 %991  ;;  %v2716_v9 = vpop.permute.xlu0 %1128 }
 0x29d   : > { %v1042_v10 = vpop.permute.xlu1 %1041  ;;  %v1125_v11 = vpop.permute.xlu0 %1124 }
 0x29e   : > { %v1145_v12 = vmul.f32 %v1125_v11, %v2557_v16  ;;  %v1081_v56 = vsel %vm1077_vm10, %v1072_v57, %v1042_v10  ;;  %v1086_v10 = vld [vmem:[#allocation5] sm:$0xff] }
 0x2a0   : > { %1322 = vrot.lane.b32.xlu0 %v1145_v12, %s2220_s29 }
 0x2a1   : > { %v1016_v13 = vpop.permute.xlu1 %1015  ;;  %v1121_v26 = vpop.permute.xlu0 %1120 }
 0x2a2   : > { %v1143_v1 = vmul.f32 %v1121_v26, %v2557_v16 }
 0x2a5   : > { %v990_v14 = vpop.permute.xlu1 %989 }
 0x2a6   : > { %v1061_v0 = vsel %vm1059_vm8, %v2587_v27, %v990_v14 }
 0x2a9   : > { %v1024_v15 = vpop.permute.xlu1 %1023 }
 0x2aa   : > { %v1075_v23 = vsel %vm1068_vm9, %v1066_v20, %v1024_v15 }
 0x2ad   : > { %v1048_v17 = vpop.permute.xlu1 %1047 }
 0x2ae   : > { %v1084_v34 = vsel %vm1077_vm10, %v1075_v23, %v1048_v17  ;;  %v1147_v23 = vmul.f32 %v2716_v9, %v2557_v16 }
 0x2af   : > { %v1100_v52 = vmul.f32 %v1092_v33, %v1084_v34 }
 0x2b1   : > { %v1002_v18 = vpop.permute.xlu1 %1001 }
 0x2b2   : > { %v1067_v21 = vsel %vm1059_vm8, %v2661_v40, %v1002_v18  ;;  %v1064_v40 = vsel %vm1059_vm8, %v2593_v30, %v996_v53  ;;  %v1062_v30 = vsel %vm1059_vm8, %v2589_v28, %v992_v8  ;;  %v1089_v53 = vld [vmem:[#allocation5 + $0x18] sm:$0xff]  ;;  %v1087_v28 = vld [vmem:[#allocation5 + $0x8] sm:$0xff] }
 0x2b3   : > { %v1073_v45 = vsel %vm1068_vm9, %v1064_v40, %v1020_v60  ;;  %v1071_v60 = vsel %vm1068_vm9, %v1062_v30, %v1016_v13  ;;  %v1097_v63 = vmul.f32 %v1089_v53, %v1081_v56  ;;  %v1151_v13 = vld [vmem:[%s2613_s28 + $0x8] sm:$0xff] }
 0x2b4   : > { %v1082_v55 = vsel %vm1077_vm10, %v1073_v45, %v1044_v2 }
 0x2b5   : > { %v1026_v19 = vpop.permute.xlu1 %1025  ;;  %v1098_v59 = vmul.f32 %v1090_v50, %v1082_v55 }
 0x2b6   : > { %v1076_v24 = vsel %vm1068_vm9, %v1067_v21, %v1026_v19 }
 0x2b9   : > { %v1050_v25 = vpop.permute.xlu1 %1049 }
 0x2ba   : > { %v1085_v35 = vsel %vm1077_vm10, %v1076_v24, %v1050_v25 }
 0x2bb   : > { %v1101_v42 = vmul.f32 %v1093_v22, %v1085_v35 }
 0x2bd   : > { %1897 = vmatprep.subr.mxu0 %v1101_v42  ;;  %v1040_v54 = vpop.permute.xlu1 %1039 }
 0x2be   : > { %1898 = vmatpush3.msra.mxu0 %v1101_v42  ;;  %v1080_v62 = vsel %vm1077_vm10, %v1071_v60, %v1040_v54 }
 0x2bf   : > { %1899 = vmatprep.subr.mxu0 %v1100_v52  ;;  %v1096_v2 = vmul.f32 %v1088_v29, %v1080_v62 }
 0x2c0   : > { %1900 = vmatpush3.msra.mxu0 %v1100_v52 }
 0x2c1   : > { %v1014_v61 = vpop.permute.xlu1 %1013  ;;  %1901 = vmatprep.subr.mxu0 %v1099_v51 }
 0x2c2   : > { %1902 = vmatpush3.msra.mxu0 %v1099_v51  ;;  %v1070_v4 = vsel %vm1068_vm9, %v1061_v0, %v1014_v61 }
 0x2c3   : > { %1903 = vmatprep.subr.mxu0 %v1098_v59 }
 0x2c4   : > { %1904 = vmatpush3.msra.mxu0 %v1098_v59 }
 0x2c5   : > { %v1038_v5 = vpop.permute.xlu1 %1037  ;;  %1905 = vmatprep.subr.mxu0 %v1097_v63 }
 0x2c6   : > { %v1079_v7 = vsel %vm1077_vm10, %v1070_v4, %v1038_v5  ;;  %1906 = vmatpush3.msra.mxu0 %v1097_v63 }
 0x2c7   : > { %v1095_v8 = vmul.f32 %v1087_v28, %v1079_v7  ;;  %1907 = vmatprep.subr.mxu0 %v1096_v2 }
 0x2c8   : > { %1908 = vmatpush3.msra.mxu0 %v1096_v2 }
 0x2c9   : > { %v1036_v11 = vpop.permute.xlu1 %1035  ;;  %1909 = vmatprep.subr.mxu0 %v1095_v8 }
 0x2ca   : > { %v1078_v27 = vsel %vm1077_vm10, %v2705_v58, %v1036_v11  ;;  %1910 = vmatpush3.msra.mxu0 %v1095_v8 }
 0x2cb   : > { %v1094_v12 = vmul.f32 %v1086_v10, %v1078_v27 }
 0x2cd   : > { %v1163_v14 = vpop.permute.xlu1 %1162  ;;  %1911 = vmatprep.subr.mxu0 %v1094_v12 }
 0x2ce   : > { %1912 = vmatpush3.msra.mxu0 %v1094_v12  ;;  %v1183_v15 = vsel %vm1059_vm8, %v1151_v13, %v1163_v14 }
 0x2cf   : > { %1914 = vmatmul.mubr.msk.f32.vlgmr.msra.gmra.mxu0 %vm473_vm0, %v2669_v41 }
 0x2d1   : > { %v1171_v17 = vpop.permute.xlu1 %1170 }
 0x2d2   : > { %v1185_v18 = vsel %vm1068_vm9, %v1183_v15, %v1171_v17 }
 0x2d5   : > { %v1179_v19 = vpop.permute.xlu1 %1178 }
 0x2d6   : > { %v1187_v58 = vsel %vm1077_vm10, %v1185_v18, %v1179_v19 }
 0x2d9   : > { %v1131_v20 = vpop.permute.xlu1 %1130 }
 0x2da   : > { %v1148_v21 = vmul.f32 %v1131_v20, %v2544_v6 }
 0x2dc   : > { %1328 = vrot.lane.b32.xlu1 %v1148_v21, %s2220_s29 }
 0x2dd   : > { %v1127_v22 = vpop.permute.xlu1 %1126 }
 0x2de   : > { %v1146_v24 = vmul.f32 %v1127_v22, %v2544_v6 }
 0x2e0   : > { %1326 = vrot.lane.b32.xlu1 %v1147_v23, %s2220_s29 }
 0x2e1   : > { %v1123_v41 = vpop.permute.xlu1 %1122 }
 0x2e2   : > { %v1144_v25 = vmul.f32 %v1123_v41, %v2544_v6 }
 0x2e4   : > { %1324 = vrot.lane.b32.xlu1 %v1146_v24, %s2220_s29 }
 0x2e5   : > { %v1119_v34 = vpop.permute.xlu1 %1118 }
 0x2e6   : > { %v1142_v59 = vmul.f32 %v1119_v34, %v2544_v6  ;;  %v1559_v34 = vld [vmem:[%s2896_s5 + $0x30] sm:$0xff] }
 0x2e8   : > { %1320 = vrot.lane.b32.xlu1 %v1144_v25, %s2220_s29 }
 0x30a   : > { %v1331_v33 = vpop.permute.xlu0 %1330 }
 0x30b   : > { %1916 = vmatprep.subr.mxu0 %v1331_v33 }
 0x30c   : > { %1917 = vmatpush3.msra.mxu0 %v1331_v33  ;;  %v1560_v33 = vld [vmem:[%s2896_s5 + $0x38] sm:$0xff] }
 0x312   : > { %v1323_v42 = vpop.permute.xlu0 %1322 }
 0x34e   : > { %v1329_v35 = vpop.permute.xlu1 %1328 }
 0x34f   : > { %1918 = vmatprep.subr.mxu0 %v1329_v35 }
 0x350   : > { %1919 = vmatpush3.msra.mxu0 %v1329_v35  ;;  %v1558_v35 = vld [vmem:[%s2896_s5 + $0x28] sm:$0xff] }
 0x352   : > { %v1327_v9 = vpop.permute.xlu1 %1326 }
 0x353   : > { %1920 = vmatprep.subr.mxu0 %v1327_v9 }
 0x354   : > { %1921 = vmatpush3.msra.mxu0 %v1327_v9  ;;  %v1557_v9 = vld [vmem:[%s2896_s5 + $0x20] sm:$0xff] }
 0x356   : > { %v1325_v32 = vpop.permute.xlu1 %1324 }
 0x357   : > { %1922 = vmatprep.subr.mxu0 %v1325_v32 }
 0x358   : > { %1923 = vmatpush3.msra.mxu0 %v1325_v32  ;;  %v1556_v32 = vld [vmem:[%s2896_s5 + $0x18] sm:$0xff] }
 0x359   : > { %1924 = vmatprep.subr.mxu0 %v1323_v42 }
 0x35a   : > { %v1321_v40 = vpop.permute.xlu1 %1320  ;;  %1925 = vmatpush3.msra.mxu0 %v1323_v42  ;;  %v1555_v42 = vld [vmem:[%s2896_s5 + $0x10] sm:$0xff] }
 0x35b   : > { %1926 = vmatprep.subr.mxu0 %v1321_v40 }
 0x35c   : > { %1927 = vmatpush3.msra.mxu0 %v1321_v40  ;;  %v1554_v40 = vld [vmem:[%s2896_s5 + $0x8] sm:$0xff] }
 0x38f   : > { %v1915_v43 = vpop.f32.mrf.mxu0 }
 0x390   : > { %v1266_v44 = vadd.f32 %v1915_v43, %v1187_v58  ;;  %v1553_v43 = vld [vmem:[%s2896_s5] sm:$0xff] }
 0x391   : > { %v1260_v54 = vpop.f32.mrf.mxu0 }
 0x392   : > { %v1286_v45 = vsel %vm1282_vm11, %v1266_v44, -inf  ;;  %v1272_v52 = vsel %vm1059_vm8, %v1266_v44, -inf  ;;  %v1261_v50 = vadd.f32 %v1260_v54, %v1186_v31  ;;  %v1293_v55 = vsel %vm1289_vm12, %v1266_v44, -inf }
 0x393   : > { %1287 = vmax.xlane.f32.xlu1 %v1286_v45  ;;  %1273 = vmax.xlane.f32.xlu0 %v1272_v52  ;;  %v1279_v51 = vsel %vm1275_vm13, %v1266_v44, -inf }
 0x394   : > { %v1276_v57 = vsel %vm1275_vm13, %v1261_v50, -inf  ;;  %v1269_v30 = vsel %vm1059_vm8, %v1261_v50, -inf  ;;  %v1283_v53 = vsel %vm1282_vm11, %v1261_v50, -inf  ;;  %v1290_v56 = vsel %vm1289_vm12, %v1261_v50, -inf }
 0x397   : > { %1294 = vmax.xlane.f32.xlu1 %v1293_v55  ;;  %1280 = vmax.xlane.f32.xlu0 %v1279_v51  ;;  %v1815_v51 = vld [vmem:[%s2899_s8] ss:$0 sm:$0xff] }
 0x39b   : > { %1277 = vmax.xlane.f32.xlu1 %v1276_v57  ;;  %1270 = vmax.xlane.f32.xlu0 %v1269_v30  ;;  %v1816_v30 = vld [vmem:[%s2900_s9] ss:$0 sm:$0xff] }
 0x39f   : > { %1284 = vmax.xlane.f32.xlu0 %v1283_v53 }
 0x3a3   : > { %1291 = vmax.xlane.f32.xlu0 %v1290_v56 }
 0x3ac   : > { %1316 = vrot.lane.b32.xlu1 %v1142_v59, %s2220_s29 }
 0x3b9   : > { %1318 = vrot.lane.b32.xlu0 %v1143_v1, %s2220_s29  ;;  %s2846_s29 = scalar_lea.hbm %s2901_s10, %s1827_s21 }
 0x41c   : > { %v1288_v3 = vpop.xlane.xlu1 %1287  ;;  %v1274_v60 = vpop.xlane.xlu0 %1273 }
 0x420   : > { %v1281_v61 = vpop.xlane.xlu0 %1280  ;;  %v1295_v29 = vpop.xlane.xlu1 %1294 }
 0x421   : > { %v1297_v62 = vsel %vm1059_vm8, %v1274_v60, %v1281_v61 }
 0x422   : > { %v1299_v0 = vsel %vm1068_vm9, %v1297_v62, %v1288_v3 }
 0x423   : > { %v1301_v28 = vsel %vm1077_vm10, %v1299_v0, %v1295_v29 }
 0x424   : > { %v1271_v63 = vpop.xlane.xlu0 %1270  ;;  %v1278_v2 = vpop.xlane.xlu1 %1277  ;;  %v1303_v6 = vsub.f32 %v1266_v44, %v1301_v28 }
 0x425   : > { %v1296_v5 = vsel %vm1059_vm8, %v1271_v63, %v1278_v2 }
 0x426   : > { %v1306_v11 = vmul.f32 1.442695, %v1303_v6 }
 0x428   : > { %v1285_v4 = vpop.xlane.xlu0 %1284  ;;  %v1317_v13 = vpop.permute.xlu1 %1316 }
 0x429   : > { %v1298_v16 = vsel %vm1068_vm9, %v1296_v5, %v1285_v4 }
 0x42c   : > { %v1292_v7 = vpop.xlane.xlu0 %1291 }
 0x42d   : > { %v1300_v8 = vsel %vm1077_vm10, %v1298_v16, %v1292_v7 }
 0x42e   : > { %v1302_v10 = vsub.f32 %v1261_v50, %v1300_v8 }
 0x430   : > { %v1304_v27 = vmul.f32 1.442695, %v1302_v10  ;;  %v1319_v12 = vpop.permute.xlu0 %1318 }
 0x431   : > { %1928 = vmatprep.subr.mxu0 %v1319_v12 }
 0x432   : > { %2049 = vpow2.f32 %v1304_v27  ;;  %1929 = vmatpush3.msra.mxu0 %v1319_v12 }
 0x433   : > { %2051 = vpow2.f32 %v1306_v11  ;;  %1930 = vmatprep.subr.mxu0 %v1317_v13 }
 0x434   : > { %1931 = vmatpush3.msra.mxu0 %v1317_v13 }
 0x435   : > { %1935 = vmatprep.subr.mxu0 %v2631_v36 }
 0x43f   : > { %v2050_v14 = vpop.eup %2049 }
 0x440   : > { %v2052_v15 = vpop.eup %2051  ;;  %1932 = vmatprep.mubr.msk.f32.mxu0 %vm473_vm0, %v2050_v14 }
 0x441   : > { %1933 = vmatmul.mubr.msk.f32.vlgmr.msra.gmra.mxu0 %vm473_vm0, %v2052_v15 }
 0x442   : > { %1936 = vmatpush3.msra.mxu0 %v2631_v36  ;;  %1951 = vmatprep.mubr.msk.f32.mxu0 %vm473_vm0, %v2050_v14 }
 0x443   : > { %1937 = vmatprep.subr.mxu0 %v2686_v46 }
 0x444   : > { %1938 = vmatpush3.msra.mxu0 %v2686_v46 }
 0x445   : > { %1939 = vmatprep.subr.mxu0 %v2637_v37 }
 0x446   : > { %1940 = vmatpush3.msra.mxu0 %v2637_v37 }
 0x447   : > { %1941 = vmatprep.subr.mxu0 %v2690_v47 }
 0x448   : > { %1942 = vmatpush3.msra.mxu0 %v2690_v47 }
 0x449   : > { %1943 = vmatprep.subr.mxu0 %v2643_v38 }
 0x44a   : > { %1944 = vmatpush3.msra.mxu0 %v2643_v38 }
 0x44b   : > { %1945 = vmatprep.subr.mxu0 %v2694_v48 }
 0x44c   : > { %1946 = vmatpush3.msra.mxu0 %v2694_v48 }
 0x44d   : > { %1947 = vmatprep.subr.mxu0 %v2649_v39 }
 0x44e   : > { %1948 = vmatpush3.msra.mxu0 %v2649_v39 }
 0x44f   : > { %1949 = vmatprep.subr.mxu0 %v2698_v49 }
 0x450   : > { %1950 = vmatpush3.msra.mxu0 %v2698_v49 }
 0x451   : > { %1952 = vmatmul.mubr.msk.f32.vlgmr.msra.gmra.mxu0 %vm473_vm0, %v2052_v15  ;;  %1954 = vmatprep.subr.mxu0 %v1560_v33 }
 0x452   : > { %1955 = vmatpush3.msra.mxu0 %v1560_v33 }
 0x453   : > { %1956 = vmatprep.subr.mxu0 %v1559_v34 }
 0x454   : > { %1957 = vmatpush3.msra.mxu0 %v1559_v34 }
 0x455   : > { %1958 = vmatprep.subr.mxu0 %v1558_v35 }
 0x456   : > { %1959 = vmatpush3.msra.mxu0 %v1558_v35 }
 0x457   : > { %1960 = vmatprep.subr.mxu0 %v1557_v9 }
 0x458   : > { %1961 = vmatpush3.msra.mxu0 %v1557_v9 }
 0x459   : > { %1962 = vmatprep.subr.mxu0 %v1556_v32 }
 0x45a   : > { %1963 = vmatpush3.msra.mxu0 %v1556_v32 }
 0x45b   : > { %1964 = vmatprep.subr.mxu0 %v1555_v42 }
 0x45c   : > { %1965 = vmatpush3.msra.mxu0 %v1555_v42 }
 0x45d   : > { %1966 = vmatprep.subr.mxu0 %v1554_v40 }
 0x45e   : > { %1967 = vmatpush3.msra.mxu0 %v1554_v40 }
 0x45f   : > { %1968 = vmatprep.subr.mxu0 %v1553_v43 }
 0x460   : > { %1969 = vmatpush3.msra.mxu0 %v1553_v43 }
 0x501   : > { %v1934_v36 = vpop.f32.mrf.mxu0 }
 0x503   : > { %v1412_v37 = vpop.f32.mrf.mxu0 }
 0x511   : > { %v1953_v46 = vpop.f32.mrf.mxu0 }
 0x512   : > { %2053 = vrcp.f32 %v1953_v46 }
 0x513   : > { %v1495_v47 = vpop.f32.mrf.mxu0 }
 0x514   : > { %2055 = vrcp.f32 %v1495_v47 }
 0x51f   : > { %v2054_v38 = vpop.eup %2053 }
 0x520   : > { %v1507_v17 = vmul.f32 %v2054_v38, %v1934_v36 }
 0x521   : > { %v2056_v18 = vpop.eup %2055 }
 0x522   : > { %v1511_v48 = vsel %vm473_vm0, %v1507_v17, 0.0  ;;  %v1506_v19 = vmul.f32 %v2056_v18, %v1412_v37 }
 0x523   : > { %1512 = vadd.xlane.f32.xlu1 %v1511_v48 }
 0x524   : > { %v1508_v39 = vsel %vm473_vm0, %v1506_v19, 0.0 }
 0x525   : > { %1509 = vadd.xlane.f32.xlu0 %v1508_v39 }
 0x5ac   : > { %v1513_v20 = vpop.xlane.xlu1 %1512 }
 0x5ad   : > { %v1516_v49 = vmul.f32 0.015625, %v1513_v20 }
 0x5ae   : > { %v1510_v21 = vpop.xlane.xlu0 %1509 }
 0x5af   : > { %v1515_v58 = vmul.f32 0.015625, %v1510_v21  ;;  %v1518_v22 = vsub.f32 %v1507_v17, %v1516_v49 }
 0x5b1   : > { %v1517_v23 = vsub.f32 %v1506_v19, %v1515_v58  ;;  %v1520_v25 = vmul.f32 %v1518_v22, %v1518_v22 }
 0x5b3   : > { %v1519_v24 = vmul.f32 %v1517_v23, %v1517_v23  ;;  %v1524_v26 = vsel %vm473_vm0, %v1520_v25, 0.0 }
 0x5b5   : > { %v1521_v41 = vsel %vm473_vm0, %v1519_v24, 0.0 }
 0x5b6   : > { %1522 = vadd.xlane.f32.xlu0 %v1521_v41 }
 0x5ba   : > { %1525 = vadd.xlane.f32.xlu0 %v1524_v26 }
 0x63f   : > { %v1523_v44 = vpop.xlane.xlu0 %1522 }
 0x640   : > { %v1527_v45 = vmul.f32 0.015625, %v1523_v44 }
 0x642   : > { %v1529_v52 = vadd.f32 1e-05, %v1527_v45 }
 0x643   : > { %v1526_v54 = vpop.xlane.xlu0 %1525 }
 0x644   : > { %2057 = vrsqrt.f32 %v1529_v52  ;;  %v1528_v31 = vmul.f32 0.015625, %v1526_v54 }
 0x646   : > { %v1530_v50 = vadd.f32 1e-05, %v1528_v31 }
 0x648   : > { %2059 = vrsqrt.f32 %v1530_v50 }
 0x651   : > { %v2058_v55 = vpop.eup %2057 }
 0x652   : > { %v1533_v57 = vmul.f32 %v2058_v55, %v1517_v23 }
 0x654   : > { %v1542_v53 = vmul.f32 %v1815_v51, %v1533_v57 }
 0x655   : > { %v2060_v56 = vpop.eup %2059 }
 0x656   : > { %v1534_v59 = vmul.f32 %v2060_v56, %v1518_v22  ;;  %v1551_v1 = vadd.f32 %v1816_v30, %v1542_v53 }
 0x658   : > { %v1543_v3 = vmul.f32 %v1815_v51, %v1534_v59  ;;  %1970 = vmatprep.mubr.msk.f32.mxu0 %vm473_vm0, %v1551_v1 }
 0x65a   : > { %v1552_v60 = vadd.f32 %v1816_v30, %v1543_v3 }
 0x65c   : > { %1971 = vmatmul.mubr.msk.f32.vlgmr.msra.gmra.mxu0 %vm473_vm0, %v1552_v60 }
 0x71c   : > { %v1972_v61 = vpop.f32.mrf.mxu0 }
 0x71d   : > { %1643 = vst.msk [vmem:[%s436_s7 + $0x8] sm:$0xff] %vm473_vm0, %v1972_v61 }
 0x71e   : > { %v1633_v29 = vpop.f32.mrf.mxu0 }
 0x71f   : > { %1642 = vst.msk [vmem:[%s436_s7] sm:$0xff] %vm473_vm0, %v1633_v29 }
 0x720   : > { %2154 = shalt.err (!%p2151_p11)
}
 0x721   : > { %s2155_s25 = scalar_lea.hbm %s2846_s29, 256  ;;  %s2159_s6 = scalar_lea.hbm %s2901_s10, 512 }
 0x722   : > { %p2156_p9 = scmp.ne.s32.totalorder %s2846_s29, %s2155_s25  ;;  %p2160_p6 = scmp.lt.s32.totalorder %s2846_s29, %s2901_s10 }
 0x723   : > { %p2161_p8 = scmp.lt.s32.totalorder %s2159_s6, %s2155_s25 }
 0x724   : > { %p2157_p1 = pnand %p2156_p9, %p2927_p7 }
 0x725   : > { %p2162_p5 = por %p2161_p8, %p2160_p6 }
 0x726   : > { %p2158_p4 = pneg %p2157_p1 }
 0x728   : > { %p2163_p2 = pnand %p2162_p5, %p2158_p4 }
 0x72a   : > { %2166 = shalt.err (!%p2163_p2)
}
 0x72b   : > { %s2222_s28 = smov 128   ;;  %s2223_s24 = smov 8  }
 0x72c   : > { %1983 = dma.vmem_to_hbm [thread:$0]  (%p2927_p7), %s2841_s18, 256, %s2846_s29, %s1645_s12, %s2222_s28, %s2222_s28, %s2223_s24  }
 0x72d PF: > { %s1673_s15 = sand.u32 1, %s2197_s13   ;;  %p2928_p12 = scmp.ne.s32.totalorder %s2913_s20, 0 }
 0x72e   : > { %p2929_p13 = scmp.ge.s32.totalorder %s2209_s16, 2  ;;  %s1674_s17 = scalar_lea.sflag [#allocation4], %s1673_s15 }
 0x730   : > { %p1997_p0 = pnand %p2929_p13, %p2928_p12 }
 0x732   : > { %p1998_p10 = pneg %p1997_p0 }
 0x734   : > { %2192 = dma.done.wait (%p1998_p10), %s1674_s17, 256  }
 0x735   : > { %2194 = vsyncadd (%p1998_p10), %s1674_s17, 4294967040  ;;  %s2930_s19 = sld [smem:[#allocation12_spill]]  ;;  %p24_p3 = scmp.ge.s32.totalorder %s2357_s23, 4  }
 0x736   : > { %s2931_s15 = sld [smem:[#allocation13_spill]]  ;;  %s2932_s13 = smov %s2201_s14 }
 0x737   : > { %s2934_s16 = smov %s2357_s23  ;;  %26 = sbr.rel (!%p24_p3) target bundleno = 9 (0x9), region = 119 }
 0x73b   : > { %s2933_s14 = smov %s2930_s19 }
 0x73c   :  { %1679 = vsyncpa [#allocation3], 1 }
 0x73d   :  { %1681 = vsyncpa [#allocation3 + $0x1], 1 }
 0x73e   :  { %1682 = vsyncpa [#allocation6], 1 }
 0x73f   :  { %1683 = vsyncpa [#allocation4], 1 }
 0x740   :  { %1685 = vsyncpa [#allocation4 + $0x1], 1 }

</bundles_post_ra>
